<compile_context>
chip_gen: v7x
topology: tpu7x:2x2x1
jax: 0.10.0
libtpu: 0.0.40
codegen_flags: <defaults>
</compile_context>

<pallas_src>
import functools

import jax
import jax.numpy as jnp
from jax.experimental import pallas as pl
from jax.experimental.pallas import tpu as pltpu

FEAT_PAD = 128   # shared lane-dense width of all CNN feature intermediates
LABEL_PAD = 128  # lane-dense width of the logits slab written by the kernel


# ---------------------------------------------------------------------------
# Fused Pallas kernel: embeddings + both CNN branches + concat + label Linear
# (one batch tile of TB sequences per grid step)
# ---------------------------------------------------------------------------
def _fused_forward_kernel(
    word_ids_ref, char_ids_ref,              # [TB*Lw,1] / [TB*Lc,1] int32
    word_emb_ref, char_emb_ref,              # [Vw,Dw] / [Vc,Dc] f32 (VMEM resident)
    w_word_ref, b_word_ref, ksz_word_ref,    # [Kw,Dw,128], [1,128] f32, [1,128] i32
    w_char_ref, b_char_ref, ksz_char_ref,    # [Kc,Dc,128], [1,128] f32, [1,128] i32
    w_label_ref, b_label_ref,                # [128, LABEL_PAD], [1, LABEL_PAD]
    o_ref,                                   # [TB, LABEL_PAD]
    *, TB, Lw, Lc, Kw, Kc,
):
    def cnn_branch(ids_ref, emb_ref, w_ref, b_ref, ksz_ref, L, Kmax):
        N = TB * L
        V, _ = emb_ref.shape
        Fp = w_ref.shape[-1]                                  # 128

        # --- embedding lookup as an exact one-hot f32 matmul (MXU) ----------
        # TODO(synk): swap for an HBM row-gather (pl.ANY + DMA) at real vocab sizes.
        onehot = (ids_ref[...] ==
                  jax.lax.broadcasted_iota(jnp.int32, (N, V), 1)
                  ).astype(jnp.float32)                       # [N, V]
        x = jnp.dot(onehot, emb_ref[...],
                    preferred_element_type=jnp.float32)       # [N, D]

        # --- Conv1d as Kmax per-tap matmuls into one lane-dense accumulator -
        # Tap t needs rows x[n + t]; pltpu.roll(x, N - t) == jnp.roll(x, -t).
        # Wrapped rows only reach positions zeroed by the validity mask below.
        acc = jnp.dot(x, w_ref[0], preferred_element_type=jnp.float32)
        for t in range(1, Kmax):
            x_t = pltpu.roll(x, shift=N - t, axis=0)          # row n -> x[n + t]
            acc = acc + jnp.dot(x_t, w_ref[t],
                                preferred_element_type=jnp.float32)
        acc = jnp.maximum(acc + b_ref[...], 0.0)              # bias + ReLU  [N,128]

        # --- in-kernel validity mask, applied AFTER ReLU (values >= 0) ------
        # Column f is valid at positions pos <= L - ksz_col[f]; padding columns
        # carry ksz=1 (always "valid") but are identically zero anyway.
        pos = jax.lax.broadcasted_iota(jnp.int32, (L, Fp), 0)             # [L,128]
        mask = (pos <= (L - ksz_ref[...])).astype(jnp.float32)            # [L,128]
        acc3 = acc.reshape(TB, L, Fp) * mask                              # bcast TB

        # --- max-over-time: single reshape-based sublane reduce -------------
        return jnp.max(acc3, axis=1)                                      # [TB,128]

    word_ft = cnn_branch(word_ids_ref, word_emb_ref,
                         w_word_ref, b_word_ref, ksz_word_ref, Lw, Kw)
    char_ft = cnn_branch(char_ids_ref, char_emb_ref,
                         w_char_ref, b_char_ref, ksz_char_ref, Lc, Kc)

    # Word / char features occupy disjoint lane columns of the shared 128-wide
    # slab, so the feature concat is a lane-dense add (no XLU lane packing).
    ft = word_ft + char_ft                                                # [TB,128]
    o_ref[...] = (jnp.dot(ft, w_label_ref[...],
                          preferred_element_type=jnp.float32)
                  + b_label_ref[...])


# ---------------------------------------------------------------------------
# Parameter construction (lane-dense stacked conv weights) + wrapper
# ---------------------------------------------------------------------------
def init_params(key, cf, vocab_sizes):
    n_word, n_char, n_label = vocab_sizes
    assert n_label <= LABEL_PAD
    # Faithfully reproduce the swapped kernel-size lists of the original module.
    ks_word_eff = list(cf["kernel_sizes_char"])   # used for the word CNN
    ks_char_eff = list(cf["kernel_sizes_word"])   # used for the char CNN
    Dw, Dc = cf["word_embedding_dim"], cf["char_embedding_dim"]
    Fw, Fc = cf["filter_num_word"], cf["filter_num_char"]

    width_word = len(ks_word_eff) * Fw
    width_char = len(ks_char_eff) * Fc
    len_ft = width_word + width_char
    assert len_ft <= FEAT_PAD

    keys = jax.random.split(key, 8)

    def uniform(k, shape, s):
        return jax.random.uniform(k, shape, jnp.float32, -s, s)

    params = {}
    params["word_emb"] = uniform(keys[0], (n_word, Dw), 0.1)
    params["char_emb"] = uniform(keys[1], (n_char, Dc), 0.1)

    def stacked_conv(k, ks_list, D, F, col_offset):
        """All kernel-size variants of a branch in one lane-dense [Kmax,D,128] weight."""
        Kmax = max(ks_list)
        W = jnp.zeros((Kmax, D, FEAT_PAD), jnp.float32)
        b = jnp.zeros((1, FEAT_PAD), jnp.float32)
        ksz_col = jnp.ones((1, FEAT_PAD), jnp.int32)   # padding cols: always-valid, value 0
        for g, ksz in enumerate(ks_list):
            k, k1, k2 = jax.random.split(k, 3)
            s = (1.0 / (D * ksz)) ** 0.5               # PyTorch Conv1d default init bound
            c0 = col_offset + g * F
            W = W.at[:ksz, :, c0:c0 + F].set(uniform(k1, (ksz, D, F), s))
            b = b.at[0, c0:c0 + F].set(uniform(k2, (F,), s))
            ksz_col = ksz_col.at[0, c0:c0 + F].set(ksz)
        return W, b, ksz_col

    params["w_word"], params["b_word"], params["ksz_word"] = stacked_conv(
        keys[2], ks_word_eff, Dw, Fw, 0)
    params["w_char"], params["b_char"], params["ksz_char"] = stacked_conv(
        keys[3], ks_char_eff, Dc, Fc, width_word)

    # Label Linear: xavier-uniform weight (use_xavier_weight_init=True) in rows
    # [0:len_ft] of a lane-dense [128, LABEL_PAD] matrix; zero padding rows/cols.
    xav = (6.0 / (len_ft + n_label)) ** 0.5
    w_lab = uniform(keys[4], (len_ft, n_label), xav)
    params["w_label"] = (jnp.zeros((FEAT_PAD, LABEL_PAD), jnp.float32)
                         .at[:len_ft, :n_label].set(w_lab))
    b_bound = (1.0 / len_ft) ** 0.5                    # nn.Linear default bias init
    params["b_label"] = (jnp.zeros((1, LABEL_PAD), jnp.float32)
                         .at[0, :n_label].set(uniform(keys[5], (n_label,), b_bound)))

    params["kernel_sizes_word_eff"] = ks_word_eff
    params["kernel_sizes_char_eff"] = ks_char_eff
    params["filter_num_word"] = Fw
    params["filter_num_char"] = Fc
    params["char_col_offset"] = width_word
    params["len_ft"] = len_ft
    params["n_label"] = n_label
    return params


def forward(params, inputs_word, inputs_char, *, batch_tile=None):
    B, Lw = inputs_word.shape
    Bc, Lc = inputs_char.shape
    assert B == Bc
    ks_w = params["kernel_sizes_word_eff"]
    ks_c = params["kernel_sizes_char_eff"]
    Kw, Kc = max(ks_w), max(ks_c)
    assert Lw >= Kw and Lc >= Kc, "sequence shorter than largest conv kernel"
    assert Lw % 8 == 0 and Lc % 8 == 0, "pad sequences to a multiple of 8"

    # Batch-tile grid: TB sequences per grid step (8 rows keeps the output
    # block sublane-aligned); weights stay VMEM-resident across steps.
    TB = batch_tile if batch_tile is not None else (8 if B % 8 == 0 else B)
    assert B % TB == 0
    num_tiles = B // TB

    kernel = functools.partial(_fused_forward_kernel,
                               TB=TB, Lw=Lw, Lc=Lc, Kw=Kw, Kc=Kc)
    const2 = lambda i: (0, 0)
    const3 = lambda i: (0, 0, 0)

    out = pl.pallas_call(
        kernel,
        out_shape=jax.ShapeDtypeStruct((B, LABEL_PAD), jnp.float32),
        grid=(num_tiles,),
        in_specs=[
            pl.BlockSpec((TB * Lw, 1), lambda i: (i, 0)),          # word ids (per tile)
            pl.BlockSpec((TB * Lc, 1), lambda i: (i, 0)),          # char ids (per tile)
            pl.BlockSpec(params["word_emb"].shape, const2),        # VMEM-resident
            pl.BlockSpec(params["char_emb"].shape, const2),
            pl.BlockSpec(params["w_word"].shape, const3),
            pl.BlockSpec((1, FEAT_PAD), const2),
            pl.BlockSpec((1, FEAT_PAD), const2),
            pl.BlockSpec(params["w_char"].shape, const3),
            pl.BlockSpec((1, FEAT_PAD), const2),
            pl.BlockSpec((1, FEAT_PAD), const2),
            pl.BlockSpec((FEAT_PAD, LABEL_PAD), const2),
            pl.BlockSpec((1, LABEL_PAD), const2),
        ],
        out_specs=pl.BlockSpec((TB, LABEL_PAD), lambda i: (i, 0)),
        compiler_params=pltpu.CompilerParams(
            dimension_semantics=("parallel",)),
    )(
        inputs_word.reshape(B * Lw, 1).astype(jnp.int32),
        inputs_char.reshape(B * Lc, 1).astype(jnp.int32),
        params["word_emb"], params["char_emb"],
        params["w_word"], params["b_word"], params["ksz_word"],
        params["w_char"], params["b_char"], params["ksz_char"],
        params["w_label"], params["b_label"],
    )
    # dropout_ffw / dropout_cnn are identity at inference (torch.no_grad forward).
    return out[:, :params["n_label"]]


# ---------------------------------------------------------------------------
# Pure-JAX reference (independent Conv1d+ReLU+maxpool formulation) for a check
# ---------------------------------------------------------------------------
def _reference_forward(params, inputs_word, inputs_char):
    def branch(ids, emb, W, b, ks_list, F, col_offset):
        x = emb[ids]                                   # [B, L, D]
        _, L, _ = x.shape
        feats = []
        for g, ksz in enumerate(ks_list):
            c0 = col_offset + g * F
            Wg = W[:ksz, :, c0:c0 + F]                 # [ksz, D, F]
            bg = b[0, c0:c0 + F]
            L_out = L - ksz + 1
            conv = sum(jnp.einsum("bld,df->blf", x[:, t:t + L_out, :], Wg[t])
                       for t in range(ksz)) + bg
            feats.append(jnp.max(jnp.maximum(conv, 0.0), axis=1))
        return jnp.concatenate(feats, axis=-1)

    word_ft = branch(inputs_word, params["word_emb"], params["w_word"],
                     params["b_word"], params["kernel_sizes_word_eff"],
                     params["filter_num_word"], 0)
    char_ft = branch(inputs_char, params["char_emb"], params["w_char"],
                     params["b_char"], params["kernel_sizes_char_eff"],
                     params["filter_num_char"], params["char_col_offset"])
    ft = jnp.concatenate([word_ft, char_ft], axis=-1)  # [B, len_ft]
    n = params["n_label"]
    return ft @ params["w_label"][:params["len_ft"], :n] + params["b_label"][:, :n]


# ---------------------------------------------------------------------------
if __name__ == "__main__":
    cf = {
        "filter_num_word": 8,
        "filter_num_char": 8,
        "kernel_sizes_word": [2, 3],      # swapped by the module -> used for the char CNN
        "kernel_sizes_char": [3, 4, 5],   # swapped by the module -> used for the word CNN
        "word_embedding_dim": 32,
        "char_embedding_dim": 16,
        "dropout_cnn": 0.1,
        "dropout_ffw": 0.1,
        "D_cnn": "1_D",
    }
    vocab_sizes = (100, 50, 5)  # (|vocab_word|, |vocab_char|, |vocab_label|)

    key = jax.random.PRNGKey(0)
    k_params, k_word, k_char = jax.random.split(key, 3)
    params = init_params(k_params, cf, vocab_sizes)

    # Small, but two batch tiles of 8 so the "parallel" batch grid is exercised
    # (shards across v7x's two TensorCores, amortizes the weight/table DMA).
    B, Lw, Lc = 16, 16, 24
    inputs_word = jax.random.randint(k_word, (B, Lw), 0, vocab_sizes[0], jnp.int32)
    inputs_char = jax.random.randint(k_char, (B, Lc), 0, vocab_sizes[1], jnp.int32)

    logits = forward(params, inputs_word, inputs_char)
    jax.block_until_ready(logits)
    assert logits.shape == (B, vocab_sizes[2]), logits.shape

    ref = _reference_forward(params, inputs_word, inputs_char)
    max_err = float(jnp.max(jnp.abs(logits - ref)))
    assert jnp.allclose(logits, ref, atol=1e-4, rtol=1e-4), max_err

    print("KERNEL_OK")
</pallas_src>

<mosaic_0001>
module attributes {stable_mosaic.version = 11 : i64} {
  func.func @_fused_forward_kernel(%arg0: i32, %arg1: memref<128x1xi32, #tpu.memory_space<vmem>>, %arg2: memref<192x1xi32, #tpu.memory_space<vmem>>, %arg3: memref<100x32xf32, #tpu.memory_space<vmem>>, %arg4: memref<50x16xf32, #tpu.memory_space<vmem>>, %arg5: memref<5x32x128xf32, #tpu.memory_space<vmem>>, %arg6: memref<1x128xf32, #tpu.memory_space<vmem>>, %arg7: memref<1x128xi32, #tpu.memory_space<vmem>>, %arg8: memref<3x16x128xf32, #tpu.memory_space<vmem>>, %arg9: memref<1x128xf32, #tpu.memory_space<vmem>>, %arg10: memref<1x128xi32, #tpu.memory_space<vmem>>, %arg11: memref<128x128xf32, #tpu.memory_space<vmem>>, %arg12: memref<1x128xf32, #tpu.memory_space<vmem>>, %arg13: memref<8x128xf32, #tpu.memory_space<vmem>>) attributes {dimension_semantics = [#tpu.dimension_semantics<parallel>], iteration_bounds = array<i64: 2>, scalar_prefetch = 0 : i64, scratch_operands = 0 : i64, tpu.core_type = #tpu.core_type<tc>, window_params = [{transform_indices = @transform_0, window_bounds = array<i64: 128, 1>}, {transform_indices = @transform_1, window_bounds = array<i64: 192, 1>}, {pipeline_mode = #tpu.pipeline_mode<synchronous>, transform_indices = @transform_2, window_bounds = array<i64: 100, 32>}, {pipeline_mode = #tpu.pipeline_mode<synchronous>, transform_indices = @transform_3, window_bounds = array<i64: 50, 16>}, {pipeline_mode = #tpu.pipeline_mode<synchronous>, transform_indices = @transform_4, window_bounds = array<i64: 5, 32, 128>}, {pipeline_mode = #tpu.pipeline_mode<synchronous>, transform_indices = @transform_5, window_bounds = array<i64: 1, 128>}, {pipeline_mode = #tpu.pipeline_mode<synchronous>, transform_indices = @transform_6, window_bounds = array<i64: 1, 128>}, {pipeline_mode = #tpu.pipeline_mode<synchronous>, transform_indices = @transform_7, window_bounds = array<i64: 3, 16, 128>}, {pipeline_mode = #tpu.pipeline_mode<synchronous>, transform_indices = @transform_8, window_bounds = array<i64: 1, 128>}, {pipeline_mode = #tpu.pipeline_mode<synchronous>, transform_indices = @transform_9, window_bounds = array<i64: 1, 128>}, {pipeline_mode = #tpu.pipeline_mode<synchronous>, transform_indices = @transform_10, window_bounds = array<i64: 128, 128>}, {pipeline_mode = #tpu.pipeline_mode<synchronous>, transform_indices = @transform_11, window_bounds = array<i64: 1, 128>}, {transform_indices = @transform_12, window_bounds = array<i64: 8, 128>}]} {
    %c0 = arith.constant 0 : index
    %c0_0 = arith.constant 0 : index
    %0 = vector.load %arg1[%c0, %c0_0] : memref<128x1xi32, #tpu.memory_space<vmem>>, vector<128x1xi32>
    %1 = tpu.iota {dimensions = array<i32: 1>} : vector<128x100xi32>
    %2 = vector.broadcast %0 : vector<128x1xi32> to vector<128x100xi32>
    %3 = arith.cmpi eq, %2, %1 : vector<128x100xi32>
    %4 = arith.extui %3 : vector<128x100xi1> to vector<128x100xi32>
    %5 = arith.sitofp %4 : vector<128x100xi32> to vector<128x100xf32>
    %c0_1 = arith.constant 0 : index
    %c0_2 = arith.constant 0 : index
    %6 = vector.load %arg3[%c0_1, %c0_2] : memref<100x32xf32, #tpu.memory_space<vmem>>, vector<100x32xf32>
    %cst = arith.constant dense<0.000000e+00> : vector<128x32xf32>
    %7 = tpu.matmul %5, %6, %cst {dimension_numbers = #tpu.dot_dimension_numbers<[1], [0], [0], [1], [0, 0, 1, 1], [], []>} : vector<128x100xf32>, vector<100x32xf32>, vector<128x32xf32> -> vector<128x32xf32>
    %c0_3 = arith.constant 0 : index
    %c0_4 = arith.constant 0 : index
    %c0_5 = arith.constant 0 : index
    %8 = vector.load %arg5[%c0_3, %c0_4, %c0_5] : memref<5x32x128xf32, #tpu.memory_space<vmem>>, vector<1x32x128xf32>
    %9 = vector.shape_cast %8 : vector<1x32x128xf32> to vector<32x128xf32>
    %cst_6 = arith.constant dense<0.000000e+00> : vector<128x128xf32>
    %10 = tpu.matmul %7, %9, %cst_6 {dimension_numbers = #tpu.dot_dimension_numbers<[1], [0], [0], [1], [0, 0, 1, 1], [], []>} : vector<128x32xf32>, vector<32x128xf32>, vector<128x128xf32> -> vector<128x128xf32>
    %c127_i32 = arith.constant 127 : i32
    %11 = tpu.dynamic_rotate %7 by %c127_i32 dim 0 : vector<128x32xf32>, i32 -> vector<128x32xf32>
    %c1 = arith.constant 1 : index
    %c0_7 = arith.constant 0 : index
    %c0_8 = arith.constant 0 : index
    %12 = vector.load %arg5[%c1, %c0_7, %c0_8] : memref<5x32x128xf32, #tpu.memory_space<vmem>>, vector<1x32x128xf32>
    %13 = vector.shape_cast %12 : vector<1x32x128xf32> to vector<32x128xf32>
    %cst_9 = arith.constant dense<0.000000e+00> : vector<128x128xf32>
    %14 = tpu.matmul %11, %13, %cst_9 {dimension_numbers = #tpu.dot_dimension_numbers<[1], [0], [0], [1], [0, 0, 1, 1], [], []>} : vector<128x32xf32>, vector<32x128xf32>, vector<128x128xf32> -> vector<128x128xf32>
    %15 = arith.addf %10, %14 : vector<128x128xf32>
    %c126_i32 = arith.constant 126 : i32
    %16 = tpu.dynamic_rotate %7 by %c126_i32 dim 0 : vector<128x32xf32>, i32 -> vector<128x32xf32>
    %c2 = arith.constant 2 : index
    %c0_10 = arith.constant 0 : index
    %c0_11 = arith.constant 0 : index
    %17 = vector.load %arg5[%c2, %c0_10, %c0_11] : memref<5x32x128xf32, #tpu.memory_space<vmem>>, vector<1x32x128xf32>
    %18 = vector.shape_cast %17 : vector<1x32x128xf32> to vector<32x128xf32>
    %cst_12 = arith.constant dense<0.000000e+00> : vector<128x128xf32>
    %19 = tpu.matmul %16, %18, %cst_12 {dimension_numbers = #tpu.dot_dimension_numbers<[1], [0], [0], [1], [0, 0, 1, 1], [], []>} : vector<128x32xf32>, vector<32x128xf32>, vector<128x128xf32> -> vector<128x128xf32>
    %20 = arith.addf %15, %19 : vector<128x128xf32>
    %c125_i32 = arith.constant 125 : i32
    %21 = tpu.dynamic_rotate %7 by %c125_i32 dim 0 : vector<128x32xf32>, i32 -> vector<128x32xf32>
    %c3 = arith.constant 3 : index
    %c0_13 = arith.constant 0 : index
    %c0_14 = arith.constant 0 : index
    %22 = vector.load %arg5[%c3, %c0_13, %c0_14] : memref<5x32x128xf32, #tpu.memory_space<vmem>>, vector<1x32x128xf32>
    %23 = vector.shape_cast %22 : vector<1x32x128xf32> to vector<32x128xf32>
    %cst_15 = arith.constant dense<0.000000e+00> : vector<128x128xf32>
    %24 = tpu.matmul %21, %23, %cst_15 {dimension_numbers = #tpu.dot_dimension_numbers<[1], [0], [0], [1], [0, 0, 1, 1], [], []>} : vector<128x32xf32>, vector<32x128xf32>, vector<128x128xf32> -> vector<128x128xf32>
    %25 = arith.addf %20, %24 : vector<128x128xf32>
    %c124_i32 = arith.constant 124 : i32
    %26 = tpu.dynamic_rotate %7 by %c124_i32 dim 0 : vector<128x32xf32>, i32 -> vector<128x32xf32>
    %c4 = arith.constant 4 : index
    %c0_16 = arith.constant 0 : index
    %c0_17 = arith.constant 0 : index
    %27 = vector.load %arg5[%c4, %c0_16, %c0_17] : memref<5x32x128xf32, #tpu.memory_space<vmem>>, vector<1x32x128xf32>
    %28 = vector.shape_cast %27 : vector<1x32x128xf32> to vector<32x128xf32>
    %cst_18 = arith.constant dense<0.000000e+00> : vector<128x128xf32>
    %29 = tpu.matmul %26, %28, %cst_18 {dimension_numbers = #tpu.dot_dimension_numbers<[1], [0], [0], [1], [0, 0, 1, 1], [], []>} : vector<128x32xf32>, vector<32x128xf32>, vector<128x128xf32> -> vector<128x128xf32>
    %30 = arith.addf %25, %29 : vector<128x128xf32>
    %c0_19 = arith.constant 0 : index
    %c0_20 = arith.constant 0 : index
    %31 = vector.load %arg6[%c0_19, %c0_20] : memref<1x128xf32, #tpu.memory_space<vmem>>, vector<1x128xf32>
    %32 = vector.broadcast %31 : vector<1x128xf32> to vector<128x128xf32>
    %33 = arith.addf %30, %32 : vector<128x128xf32>
    %cst_21 = arith.constant 0.000000e+00 : f32
    %34 = vector.broadcast %cst_21 : f32 to vector<128x128xf32>
    %35 = arith.maximumf %33, %34 : vector<128x128xf32>
    %36 = tpu.iota {dimensions = array<i32: 0>} : vector<16x128xi32>
    %c0_22 = arith.constant 0 : index
    %c0_23 = arith.constant 0 : index
    %37 = vector.load %arg7[%c0_22, %c0_23] : memref<1x128xi32, #tpu.memory_space<vmem>>, vector<1x128xi32>
    %c16_i32 = arith.constant 16 : i32
    %38 = vector.broadcast %c16_i32 : i32 to vector<1x128xi32>
    %39 = arith.subi %38, %37 : vector<1x128xi32>
    %40 = vector.broadcast %39 : vector<1x128xi32> to vector<16x128xi32>
    %41 = arith.cmpi sle, %36, %40 : vector<16x128xi32>
    %42 = arith.extui %41 : vector<16x128xi1> to vector<16x128xi32>
    %43 = arith.sitofp %42 : vector<16x128xi32> to vector<16x128xf32>
    %44 = vector.shape_cast %35 : vector<128x128xf32> to vector<8x16x128xf32>
    %45 = vector.shape_cast %43 : vector<16x128xf32> to vector<1x16x128xf32>
    %46 = vector.broadcast %45 : vector<1x16x128xf32> to vector<8x16x128xf32>
    %47 = arith.mulf %44, %46 : vector<8x16x128xf32>
    %cst_24 = arith.constant dense<0xFF800000> : vector<8x128xf32>
    %48 = vector.multi_reduction <maximumf>, %47, %cst_24 [1] : vector<8x16x128xf32> to vector<8x128xf32>
    %c0_25 = arith.constant 0 : index
    %c0_26 = arith.constant 0 : index
    %49 = vector.load %arg2[%c0_25, %c0_26] : memref<192x1xi32, #tpu.memory_space<vmem>>, vector<192x1xi32>
    %50 = tpu.iota {dimensions = array<i32: 1>} : vector<192x50xi32>
    %51 = vector.broadcast %49 : vector<192x1xi32> to vector<192x50xi32>
    %52 = arith.cmpi eq, %51, %50 : vector<192x50xi32>
    %53 = arith.extui %52 : vector<192x50xi1> to vector<192x50xi32>
    %54 = arith.sitofp %53 : vector<192x50xi32> to vector<192x50xf32>
    %c0_27 = arith.constant 0 : index
    %c0_28 = arith.constant 0 : index
    %55 = vector.load %arg4[%c0_27, %c0_28] : memref<50x16xf32, #tpu.memory_space<vmem>>, vector<50x16xf32>
    %cst_29 = arith.constant dense<0.000000e+00> : vector<192x16xf32>
    %56 = tpu.matmul %54, %55, %cst_29 {dimension_numbers = #tpu.dot_dimension_numbers<[1], [0], [0], [1], [0, 0, 1, 1], [], []>} : vector<192x50xf32>, vector<50x16xf32>, vector<192x16xf32> -> vector<192x16xf32>
    %c0_30 = arith.constant 0 : index
    %c0_31 = arith.constant 0 : index
    %c0_32 = arith.constant 0 : index
    %57 = vector.load %arg8[%c0_30, %c0_31, %c0_32] : memref<3x16x128xf32, #tpu.memory_space<vmem>>, vector<1x16x128xf32>
    %58 = vector.shape_cast %57 : vector<1x16x128xf32> to vector<16x128xf32>
    %cst_33 = arith.constant dense<0.000000e+00> : vector<192x128xf32>
    %59 = tpu.matmul %56, %58, %cst_33 {dimension_numbers = #tpu.dot_dimension_numbers<[1], [0], [0], [1], [0, 0, 1, 1], [], []>} : vector<192x16xf32>, vector<16x128xf32>, vector<192x128xf32> -> vector<192x128xf32>
    %c191_i32 = arith.constant 191 : i32
    %60 = tpu.dynamic_rotate %56 by %c191_i32 dim 0 : vector<192x16xf32>, i32 -> vector<192x16xf32>
    %c1_34 = arith.constant 1 : index
    %c0_35 = arith.constant 0 : index
    %c0_36 = arith.constant 0 : index
    %61 = vector.load %arg8[%c1_34, %c0_35, %c0_36] : memref<3x16x128xf32, #tpu.memory_space<vmem>>, vector<1x16x128xf32>
    %62 = vector.shape_cast %61 : vector<1x16x128xf32> to vector<16x128xf32>
    %cst_37 = arith.constant dense<0.000000e+00> : vector<192x128xf32>
    %63 = tpu.matmul %60, %62, %cst_37 {dimension_numbers = #tpu.dot_dimension_numbers<[1], [0], [0], [1], [0, 0, 1, 1], [], []>} : vector<192x16xf32>, vector<16x128xf32>, vector<192x128xf32> -> vector<192x128xf32>
    %64 = arith.addf %59, %63 : vector<192x128xf32>
    %c190_i32 = arith.constant 190 : i32
    %65 = tpu.dynamic_rotate %56 by %c190_i32 dim 0 : vector<192x16xf32>, i32 -> vector<192x16xf32>
    %c2_38 = arith.constant 2 : index
    %c0_39 = arith.constant 0 : index
    %c0_40 = arith.constant 0 : index
    %66 = vector.load %arg8[%c2_38, %c0_39, %c0_40] : memref<3x16x128xf32, #tpu.memory_space<vmem>>, vector<1x16x128xf32>
    %67 = vector.shape_cast %66 : vector<1x16x128xf32> to vector<16x128xf32>
    %cst_41 = arith.constant dense<0.000000e+00> : vector<192x128xf32>
    %68 = tpu.matmul %65, %67, %cst_41 {dimension_numbers = #tpu.dot_dimension_numbers<[1], [0], [0], [1], [0, 0, 1, 1], [], []>} : vector<192x16xf32>, vector<16x128xf32>, vector<192x128xf32> -> vector<192x128xf32>
    %69 = arith.addf %64, %68 : vector<192x128xf32>
    %c0_42 = arith.constant 0 : index
    %c0_43 = arith.constant 0 : index
    %70 = vector.load %arg9[%c0_42, %c0_43] : memref<1x128xf32, #tpu.memory_space<vmem>>, vector<1x128xf32>
    %71 = vector.broadcast %70 : vector<1x128xf32> to vector<192x128xf32>
    %72 = arith.addf %69, %71 : vector<192x128xf32>
    %cst_44 = arith.constant 0.000000e+00 : f32
    %73 = vector.broadcast %cst_44 : f32 to vector<192x128xf32>
    %74 = arith.maximumf %72, %73 : vector<192x128xf32>
    %75 = tpu.iota {dimensions = array<i32: 0>} : vector<24x128xi32>
    %c0_45 = arith.constant 0 : index
    %c0_46 = arith.constant 0 : index
    %76 = vector.load %arg10[%c0_45, %c0_46] : memref<1x128xi32, #tpu.memory_space<vmem>>, vector<1x128xi32>
    %c24_i32 = arith.constant 24 : i32
    %77 = vector.broadcast %c24_i32 : i32 to vector<1x128xi32>
    %78 = arith.subi %77, %76 : vector<1x128xi32>
    %79 = vector.broadcast %78 : vector<1x128xi32> to vector<24x128xi32>
    %80 = arith.cmpi sle, %75, %79 : vector<24x128xi32>
    %81 = arith.extui %80 : vector<24x128xi1> to vector<24x128xi32>
    %82 = arith.sitofp %81 : vector<24x128xi32> to vector<24x128xf32>
    %83 = vector.shape_cast %74 : vector<192x128xf32> to vector<8x24x128xf32>
    %84 = vector.shape_cast %82 : vector<24x128xf32> to vector<1x24x128xf32>
    %85 = vector.broadcast %84 : vector<1x24x128xf32> to vector<8x24x128xf32>
    %86 = arith.mulf %83, %85 : vector<8x24x128xf32>
    %cst_47 = arith.constant dense<0xFF800000> : vector<8x128xf32>
    %87 = vector.multi_reduction <maximumf>, %86, %cst_47 [1] : vector<8x24x128xf32> to vector<8x128xf32>
    %88 = arith.addf %48, %87 : vector<8x128xf32>
    %c0_48 = arith.constant 0 : index
    %c0_49 = arith.constant 0 : index
    %89 = vector.load %arg11[%c0_48, %c0_49] : memref<128x128xf32, #tpu.memory_space<vmem>>, vector<128x128xf32>
    %cst_50 = arith.constant dense<0.000000e+00> : vector<8x128xf32>
    %90 = tpu.matmul %88, %89, %cst_50 {dimension_numbers = #tpu.dot_dimension_numbers<[1], [0], [0], [1], [0, 0, 1, 1], [], []>} : vector<8x128xf32>, vector<128x128xf32>, vector<8x128xf32> -> vector<8x128xf32>
    %c0_51 = arith.constant 0 : index
    %c0_52 = arith.constant 0 : index
    %91 = vector.load %arg12[%c0_51, %c0_52] : memref<1x128xf32, #tpu.memory_space<vmem>>, vector<1x128xf32>
    %92 = vector.broadcast %91 : vector<1x128xf32> to vector<8x128xf32>
    %93 = arith.addf %90, %92 : vector<8x128xf32>
    %c0_53 = arith.constant 0 : index
    %c0_54 = arith.constant 0 : index
    %94 = vector.load %arg13[%c0_53, %c0_54] : memref<8x128xf32, #tpu.memory_space<vmem>>, vector<8x128xf32>
    tpu.vector_store %arg13[%c0_53, %c0_54], %93 {strides = array<i32>} : memref<8x128xf32, #tpu.memory_space<vmem>>, vector<8x128xf32>,
    return
  }
  func.func @transform_0(%arg0: i32) -> (i32, i32) {
    %c0_i32 = arith.constant 0 : i32
    %c0_i32_0 = arith.constant 0 : i32
    return %arg0, %c0_i32 : i32, i32
  }
  func.func @transform_1(%arg0: i32) -> (i32, i32) {
    %c0_i32 = arith.constant 0 : i32
    %c0_i32_0 = arith.constant 0 : i32
    return %arg0, %c0_i32 : i32, i32
  }
  func.func @transform_2(%arg0: i32) -> (i32, i32) {
    %c0_i32 = arith.constant 0 : i32
    %c0_i32_0 = arith.constant 0 : i32
    %c0_i32_1 = arith.constant 0 : i32
    return %c0_i32, %c0_i32_0 : i32, i32
  }
  func.func @transform_3(%arg0: i32) -> (i32, i32) {
    %c0_i32 = arith.constant 0 : i32
    %c0_i32_0 = arith.constant 0 : i32
    %c0_i32_1 = arith.constant 0 : i32
    return %c0_i32, %c0_i32_0 : i32, i32
  }
  func.func @transform_4(%arg0: i32) -> (i32, i32, i32) {
    %c0_i32 = arith.constant 0 : i32
    %c0_i32_0 = arith.constant 0 : i32
    %c0_i32_1 = arith.constant 0 : i32
    %c0_i32_2 = arith.constant 0 : i32
    return %c0_i32, %c0_i32_0, %c0_i32_1 : i32, i32, i32
  }
  func.func @transform_5(%arg0: i32) -> (i32, i32) {
    %c0_i32 = arith.constant 0 : i32
    %c0_i32_0 = arith.constant 0 : i32
    %c0_i32_1 = arith.constant 0 : i32
    return %c0_i32, %c0_i32_0 : i32, i32
  }
  func.func @transform_6(%arg0: i32) -> (i32, i32) {
    %c0_i32 = arith.constant 0 : i32
    %c0_i32_0 = arith.constant 0 : i32
    %c0_i32_1 = arith.constant 0 : i32
    return %c0_i32, %c0_i32_0 : i32, i32
  }
  func.func @transform_7(%arg0: i32) -> (i32, i32, i32) {
    %c0_i32 = arith.constant 0 : i32
    %c0_i32_0 = arith.constant 0 : i32
    %c0_i32_1 = arith.constant 0 : i32
    %c0_i32_2 = arith.constant 0 : i32
    return %c0_i32, %c0_i32_0, %c0_i32_1 : i32, i32, i32
  }
  func.func @transform_8(%arg0: i32) -> (i32, i32) {
    %c0_i32 = arith.constant 0 : i32
    %c0_i32_0 = arith.constant 0 : i32
    %c0_i32_1 = arith.constant 0 : i32
    return %c0_i32, %c0_i32_0 : i32, i32
  }
  func.func @transform_9(%arg0: i32) -> (i32, i32) {
    %c0_i32 = arith.constant 0 : i32
    %c0_i32_0 = arith.constant 0 : i32
    %c0_i32_1 = arith.constant 0 : i32
    return %c0_i32, %c0_i32_0 : i32, i32
  }
  func.func @transform_10(%arg0: i32) -> (i32, i32) {
    %c0_i32 = arith.constant 0 : i32
    %c0_i32_0 = arith.constant 0 : i32
    %c0_i32_1 = arith.constant 0 : i32
    return %c0_i32, %c0_i32_0 : i32, i32
  }
  func.func @transform_11(%arg0: i32) -> (i32, i32) {
    %c0_i32 = arith.constant 0 : i32
    %c0_i32_0 = arith.constant 0 : i32
    %c0_i32_1 = arith.constant 0 : i32
    return %c0_i32, %c0_i32_0 : i32, i32
  }
  func.func @transform_12(%arg0: i32) -> (i32, i32) {
    %c0_i32 = arith.constant 0 : i32
    %c0_i32_0 = arith.constant 0 : i32
    return %arg0, %c0_i32 : i32, i32
  }
}

</mosaic_0001>

<bundles_post_ra>
// kernel: tpu_custom_call.1
= control target key start
LH: loop header
LB: loop body
LE: loop exit
PB: predicated region body
PF: predicated region fallthrough
CT: control target
= control target key end

     0   :  { %17 = vsyncpa [#allocation3], 0  ;;  %s6595_s0 = inlined_call_operand.vmem [shape: s32[256,1], index: 0, kind: input, shape index: {}]   ;;  %s6596_s1 = inlined_call_operand.vmem [shape: s32[384,1], index: 1, kind: input, shape index: {}]   ;;  %s6597_s2 = inlined_call_operand.vmem [shape: f32[100,32], index: 2, kind: input, shape index: {}]   ;;  %s6598_s3 = inlined_call_operand.vmem [shape: f32[50,16], index: 3, kind: input, shape index: {}]   ;;  %s6599_s4 = inlined_call_operand.vmem [shape: f32[5,32,128], index: 4, kind: input, shape index: {}]   ;;  %s6600_s5 = inlined_call_operand.vmem [shape: f32[1,128], index: 5, kind: input, shape index: {}]   ;;  %s6601_s6 = inlined_call_operand.vmem [shape: s32[1,128], index: 6, kind: input, shape index: {}]   ;;  %s6602_s7 = inlined_call_operand.vmem [shape: f32[3,16,128], index: 7, kind: input, shape index: {}]   ;;  %s6603_s8 = inlined_call_operand.vmem [shape: f32[1,128], index: 8, kind: input, shape index: {}]   ;;  %s6604_s9 = inlined_call_operand.vmem [shape: s32[1,128], index: 9, kind: input, shape index: {}]   ;;  %s6605_s10 = inlined_call_operand.vmem [shape: f32[128,128], index: 10, kind: input, shape index: {}]   ;;  %s6606_s11 = inlined_call_operand.vmem [shape: f32[1,128], index: 11, kind: input, shape index: {}]   ;;  %s6607_s12 = inlined_call_operand.hbm [shape: f32[16,128], index: 12, kind: output, shape index: {}]  }
   0x1   :  { %19 = vsyncpa [#allocation3 + $0x1], 0  ;;  %s5118_s21 = smov 0   ;;  %s5120_s22 = smov 0  }
   0x2   :  { %s5122_s23 = smov 0   ;;  %s5124_s24 = smov 0  }
   0x3 LB: > { %6632 = sst [smem:[#allocation5_spill]] %s5042_s23  ;;  %s5139_s25 = sadd.s32 4294967295, %s5046_s24   ;;  %s5046_s24 = sphi %s5124_s24, %s6706_s24   ;;  %s5042_s23 = sphi %s5122_s23, %s6703_s23   ;;  %s5038_s22 = sphi %s5120_s22, %s6705_s22   ;;  %s5034_s21 = sphi %s5118_s21, %s6704_s21  }
   0x4   : > { %s3763_s26 = sadd.s32 4294967294, %s5046_s24   ;;  %s5143_s27 = sadd.s32 1, %s5046_s24  }
   0x5   : > { %s294_s28 = sadd.s32 1, %s5042_s23  ;;  %s291_s29 = ssub.s32 %s5046_s24, %s5143_s27 }
   0x6   : > { %p304_p0 = scmp.ne.s32.totalorder %s5042_s23, %s5038_s22  ;;  %p292_p1 = scmp.eq.s32.totalorder %s291_s29, 0 }
   0x7   : > { %p305_p2 = scmp.eq.s32.totalorder %s5139_s25, 1  ;;  %p310_p3 = scmp.ne.s32.totalorder %s5038_s22, %s5034_s21 }
   0x8   : > { %p311_p4 = scmp.eq.s32.totalorder %s3763_s26, 1  ;;  %p3766_p7 = scmp.ge.s32.totalorder %s5046_s24, 1 }
   0x9   : > { %s5154_s30 = scalar_select %p292_p1, %s5042_s23, %s294_s28  }
   0xa   : > { %p5156_p5 = por %p305_p2, %p304_p0  ;;  %p5160_p6 = por %p311_p4, %p310_p3 }
   0xb   : > { %6633 = sst [smem:[#allocation6_spill]] %s5154_s30  ;;  %p377_p8 = scmp.lt.s32.totalorder %s5046_s24, 3 }
   0xd   : > { %p378_p9 = pnand %p3766_p7, %p377_p8 }
   0xf   : > { %381 = sbr.rel (%p378_p9) target bundleno = 1357 (0x54d), region = 68 }
  0x16   : > { %s3768_s15 = sshll.u32 %s5139_s25, 4  ;;  %v550_v0 = vld [vmem:[%s6597_s2] sm:$0xff]  ;;  %v551_v1 = vld [vmem:[%s6597_s2 + $0x8] sm:$0xff]  ;;  %v552_v2 = vld [vmem:[%s6597_s2 + $0x10] sm:$0xff]  ;;  %v5048_v3 = vmov 0   ;;  %vm612_vm0 = vcmask 1043456   ;;  %v452_v63 = vlaneseq }
  0x17   : > { %4983 = vset.pattern.permute.xlu1 %v5048_v3  ;;  %4982 = vset.pattern.permute.xlu0 %v5048_v3  ;;  %p425_p10 = scmp.lt.s32.totalorder %s3768_s15, 31  ;;  %v4707_v4 = vpack.c.bf16 %v551_v1, %v550_v0  ;;  %v553_v5 = vld [vmem:[%s6597_s2 + $0x18] sm:$0xff]  ;;  %v554_v7 = vld [vmem:[%s6597_s2 + $0x20] sm:$0xff]  ;;  %v555_v8 = vld [vmem:[%s6597_s2 + $0x28] sm:$0xff]  ;;  %vm563_vm1 = vcmask 818176   ;;  %v6609_v3 = vmov 0.0  }
  0x18   : > { %v4711_v6 = vpack.c.bf16 %v553_v5, %v552_v2  ;;  %v4715_v9 = vpack.c.bf16 %v555_v8, %v554_v7  ;;  %v556_v10 = vld [vmem:[%s6597_s2 + $0x30] sm:$0xff]  ;;  %v557_v13 = vld [vmem:[%s6597_s2 + $0x38] sm:$0xff]  ;;  %v558_v17 = vld [vmem:[%s6597_s2 + $0x40] sm:$0xff]  ;;  %v5267_v0 = vand.u32 127, %v452_v63  ;;  %vm2305_vm9 = vcmask 1041408   ;;  %s421_s17 = sand.u32 1, %s5038_s22  }
  0x19   : > { %s6708_s15 = smov (!%p425_p10, %s3768_s15), 31  ;;  %4708 = vmatprep.subr.bf16.mxu0 %v4707_v4  ;;  %v4719_v16 = vpack.c.bf16 %v557_v13, %v556_v10  ;;  %v559_v18 = vld [vmem:[%s6597_s2 + $0x48] sm:$0xff]  ;;  %v560_v22 = vld [vmem:[%s6597_s2 + $0x50] sm:$0xff]  ;;  %v561_v23 = vld [vmem:[%s6597_s2 + $0x58] sm:$0xff]  ;;  %s3767_s18 = sshll.u32 %s421_s17, 3 }
  0x1a   : > { %4710 = vmatpush3.bf16.msra.mxu0 %v4707_v4  ;;  %s3769_s20 = sshll.u32 %s6708_s15, 3  ;;  %v4723_v21 = vpack.c.bf16 %v559_v18, %v558_v17  ;;  %v4727_v26 = vpack.c.bf16 %v561_v23, %v560_v22  ;;  %s430_s15 = smul.u32 24, %s5139_s25  ;;  %v562_v29 = vld [vmem:[%s6597_s2 + $0x60] sm:$0xf]  ;;  %v2226_v35 = vld [vmem:[%s6598_s3 + $0x8] sm:$0xff]  ;;  %6636 = vst [vmem:[#allocation7_spill] sm:$0xff] %v5267_v0 }
  0x1b   : > { %4712 = vmatprep.subr.bf16.mxu0 %v4711_v6  ;;  %s5188_s23 = scalar_lea.vmem %s6595_s0, %s3769_s20  ;;  %v2225_v34 = vld [vmem:[%s6598_s3] sm:$0xff]  ;;  %v2227_v5 = vld [vmem:[%s6598_s3 + $0x10] sm:$0xff]  ;;  %v2230_v13 = vld [vmem:[%s6598_s3 + $0x28] sm:$0xff]  ;;  %s423_s28 = scalar_lea.vmem [#allocation2], %s3767_s18 }
  0x1c   : > { %v438_v11 = vld [vmem:[%s5188_s23 + $0x10] sm:$0xff]  ;;  %v436_v12 = vld [vmem:[%s5188_s23] sm:$0xff]  ;;  %v439_v14 = vld [vmem:[%s5188_s23 + $0x18] sm:$0xff]  ;;  %p431_p11 = scmp.lt.s32.totalorder %s430_s15, 47  ;;  %v5232_v36 = vpack.c.bf16 %v2226_v35, %v2225_v34  ;;  %s3692_s29 = sshll.u32 %s423_s28, 4  ;;  %s6555_s29 = int_to_ptr.vmem [resolvable:$true] %s3692_s29 }
  0x1d   : > { %461 = vperm.xlu1 %4983, %v438_v11   ;;  %455 = vperm.xlu0 %4982, %v436_v12   ;;  %v437_v15 = vld [vmem:[%s5188_s23 + $0x8] sm:$0xff]  ;;  %v440_v20 = vld [vmem:[%s5188_s23 + $0x20] sm:$0xff]  ;;  %v443_v24 = vld [vmem:[%s5188_s23 + $0x38] sm:$0xff]  ;;  %s3679_s30 = scalar_lea.sflag [#allocation3], %s421_s17  ;;  %s4984_s19 = scalar_lea.vmem %s6555_s29, 128 }
  0x1e   : > { %4714 = vmatpush3.bf16.msra.mxu0 %v4711_v6  ;;  %v441_v19 = vld [vmem:[%s5188_s23 + $0x28] sm:$0xff]  ;;  %v442_v25 = vld [vmem:[%s5188_s23 + $0x30] sm:$0xff]  ;;  %v444_v28 = vld [vmem:[%s5188_s23 + $0x40] sm:$0xff]  ;;  %s6710_s15 = smov (!%p431_p11, %s430_s15), 47  ;;  %p4985_p12 = scmp.ne.s32.totalorder %s6555_s29, %s4984_s19 }
  0x1f   : > { %4716 = vmatprep.subr.bf16.mxu0 %v4715_v9  ;;  %v445_v27 = vld [vmem:[%s5188_s23 + $0x48] sm:$0xff]  ;;  %v447_v30 = vld [vmem:[%s5188_s23 + $0x58] sm:$0xff]  ;;  %v446_v31 = vld [vmem:[%s5188_s23 + $0x50] sm:$0xff]  ;;  %s3770_s26 = sshll.u32 %s6710_s15, 3 }
  0x20   : > { %v449_v32 = vld [vmem:[%s5188_s23 + $0x68] sm:$0xff]  ;;  %v448_v33 = vld [vmem:[%s5188_s23 + $0x60] sm:$0xff]  ;;  %v451_v37 = vld [vmem:[%s5188_s23 + $0x78] sm:$0xff]  ;;  %s5240_s16 = scalar_lea.vmem %s6596_s1, %s3770_s26  ;;  %s4034_s26 = sshll.u32 %s5139_s25, 7 }
  0x21   : > { %464 = vperm.xlu1 %4983, %v439_v14   ;;  %458 = vperm.xlu0 %4982, %v437_v15   ;;  %v450_v38 = vld [vmem:[%s5188_s23 + $0x70] sm:$0xff]  ;;  %v2058_v39 = vld [vmem:[%s5240_s16 + $0x8] sm:$0xff]  ;;  %v2057_v40 = vld [vmem:[%s5240_s16] sm:$0xff]  ;;  %s6553_s15 = scalar_lea.hbm %s6607_s12, %s4034_s26  ;;  %p4986_p13 = pnand %p4985_p12, %p5156_p5 }
  0x22   : > { %4718 = vmatpush3.bf16.msra.mxu0 %v4715_v9  ;;  %v2060_v41 = vld [vmem:[%s5240_s16 + $0x18] sm:$0xff]  ;;  %v2059_v42 = vld [vmem:[%s5240_s16 + $0x10] sm:$0xff]  ;;  %v2062_v43 = vld [vmem:[%s5240_s16 + $0x28] sm:$0xff]  ;;  %s5052_s25 = smov [#allocation2]  }
  0x23   : > { %4720 = vmatprep.subr.bf16.mxu0 %v4719_v16  ;;  %v2061_v44 = vld [vmem:[%s5240_s16 + $0x20] sm:$0xff]  ;;  %v2064_v45 = vld [vmem:[%s5240_s16 + $0x38] sm:$0xff]  ;;  %v2063_v46 = vld [vmem:[%s5240_s16 + $0x30] sm:$0xff]  ;;  %p4987_p0 = pneg %p4986_p13  ;;  %s4988_s18 = sshll.u32 %s5052_s25, 4  ;;  %s4989_s18 = int_to_ptr.vmem [resolvable:$false] %s4988_s18 }
  0x24   : > { %v2066_v47 = vld [vmem:[%s5240_s16 + $0x48] sm:$0xff]  ;;  %v2065_v48 = vld [vmem:[%s5240_s16 + $0x40] sm:$0xff]  ;;  %v2068_v49 = vld [vmem:[%s5240_s16 + $0x58] sm:$0xff]  ;;  %s4990_s20 = scalar_lea.vmem %s4989_s18, 256  ;;  %p4991_p1 = scmp.lt.s32.totalorder %s6555_s29, %s4989_s18 }
  0x25   : > { %470 = vperm.xlu1 %4983, %v441_v19   ;;  %467 = vperm.xlu0 %4982, %v440_v20   ;;  %v2067_v50 = vld [vmem:[%s5240_s16 + $0x50] sm:$0xff]  ;;  %v2070_v51 = vld [vmem:[%s5240_s16 + $0x68] sm:$0xff]  ;;  %v2069_v52 = vld [vmem:[%s5240_s16 + $0x60] sm:$0xff]  ;;  %p4992_p2 = scmp.lt.s32.totalorder %s4990_s20, %s4984_s19 }
  0x26   : > { %4722 = vmatpush3.bf16.msra.mxu0 %v4719_v16  ;;  %v2072_v53 = vld [vmem:[%s5240_s16 + $0x78] sm:$0xff]  ;;  %v2071_v54 = vld [vmem:[%s5240_s16 + $0x70] sm:$0xff]  ;;  %v2074_v55 = vld [vmem:[%s5240_s16 + $0x88] sm:$0xff] }
  0x27   : > { %4724 = vmatprep.subr.bf16.mxu0 %v4723_v21  ;;  %v2073_v56 = vld [vmem:[%s5240_s16 + $0x80] sm:$0xff]  ;;  %v2076_v57 = vld [vmem:[%s5240_s16 + $0x98] sm:$0xff]  ;;  %v2075_v58 = vld [vmem:[%s5240_s16 + $0x90] sm:$0xff]  ;;  %p4993_p3 = por %p4992_p2, %p4991_p1 }
  0x28   : > { %v2078_v59 = vld [vmem:[%s5240_s16 + $0xa8] sm:$0xff]  ;;  %v2077_v60 = vld [vmem:[%s5240_s16 + $0xa0] sm:$0xff]  ;;  %v2080_v61 = vld [vmem:[%s5240_s16 + $0xb8] sm:$0xff] }
  0x29   : > { %476 = vperm.xlu1 %4983, %v443_v24   ;;  %473 = vperm.xlu0 %4982, %v442_v25   ;;  %v2079_v62 = vld [vmem:[%s5240_s16 + $0xb0] sm:$0xff]  ;;  %v2228_v6 = vld [vmem:[%s6598_s3 + $0x18] sm:$0xff]  ;;  %v2229_v12 = vld [vmem:[%s6598_s3 + $0x20] sm:$0xff]  ;;  %p4994_p4 = pnand %p4993_p3, %p4987_p0 }
  0x2a   : > { %4726 = vmatpush3.bf16.msra.mxu0 %v4723_v21  ;;  %v5281_v10 = vpack.c.bf16 %v2228_v6, %v2227_v5  ;;  %v5296_v16 = vpack.c.bf16 %v2230_v13, %v2229_v12  ;;  %v5311_v23 = vld [vmem:[%s6598_s3 + $0x30] sm:$0x3]  ;;  %v5390_v5 = vshrl.u32 %v452_v63, 7 }
  0x2b   : > { %4728 = vmatprep.subr.bf16.mxu0 %v4727_v26  ;;  %6639 = vst [vmem:[#allocation10_spill] sm:$0xff] %v5311_v23 }
  0x2c   : > { %6637 = vst [vmem:[#allocation8_spill] sm:$0xff] %v5281_v10  ;;  %6638 = vst [vmem:[#allocation9_spill] sm:$0xff] %v5296_v16 }
  0x2d   : > { %482 = vperm.xlu1 %4983, %v445_v27   ;;  %479 = vperm.xlu0 %4982, %v444_v28  }
  0x2e   : > { %4730 = vmatpush3.bf16.msra.mxu0 %v4727_v26 }
  0x2f   : > { %4316 = vmatprep.subr.msk.mxu0 %vm612_vm0, %v562_v29 }
  0x31   : > { %488 = vperm.xlu1 %4983, %v447_v30   ;;  %485 = vperm.xlu0 %4982, %v446_v31  }
  0x32   : > { %4317 = vmatpush3.msk.msra.mxu0 %vm612_vm0, %v562_v29 }
  0x33   : > { %4772 = vmatprep.subr.bf16.mxu0 %v5232_v36 }
  0x35   : > { %494 = vperm.xlu1 %4983, %v449_v32   ;;  %491 = vperm.xlu0 %4982, %v448_v33  }
  0x39   : > { %500 = vperm.xlu1 %4983, %v451_v37   ;;  %497 = vperm.xlu0 %4982, %v450_v38  }
  0x3d   : > { %2085 = vperm.xlu1 %4983, %v2058_v39   ;;  %2082 = vperm.xlu0 %4982, %v2057_v40  }
  0x41   : > { %2091 = vperm.xlu1 %4983, %v2060_v41   ;;  %2088 = vperm.xlu0 %4982, %v2059_v42  }
  0x45   : > { %2097 = vperm.xlu1 %4983, %v2062_v43   ;;  %2094 = vperm.xlu0 %4982, %v2061_v44  }
  0x49   : > { %2103 = vperm.xlu1 %4983, %v2064_v45   ;;  %2100 = vperm.xlu0 %4982, %v2063_v46  }
  0x4d   : > { %2109 = vperm.xlu1 %4983, %v2066_v47   ;;  %2106 = vperm.xlu0 %4982, %v2065_v48  }
  0x51   : > { %2115 = vperm.xlu1 %4983, %v2068_v49   ;;  %2112 = vperm.xlu0 %4982, %v2067_v50  }
  0x55   : > { %2121 = vperm.xlu1 %4983, %v2070_v51   ;;  %2118 = vperm.xlu0 %4982, %v2069_v52  }
  0x59   : > { %2127 = vperm.xlu1 %4983, %v2072_v53   ;;  %2124 = vperm.xlu0 %4982, %v2071_v54   ;;  %v3804_v54 = vld [vmem:[%s6599_s4 + $0x20] sm:$0xff] }
  0x5d   : > { %2133 = vperm.xlu1 %4983, %v2074_v55   ;;  %2130 = vperm.xlu0 %4982, %v2073_v56   ;;  %v3805_v55 = vld [vmem:[%s6599_s4 + $0x28] sm:$0xff] }
  0x5e   : > { %v4731_v56 = vpack.c.bf16 %v3805_v55, %v3804_v54 }
  0x60   : > { %4732 = vmatprep.subr.bf16.mxu1 %v4731_v56 }
  0x61   : > { %2139 = vperm.xlu1 %4983, %v2076_v57   ;;  %2136 = vperm.xlu0 %4982, %v2075_v58   ;;  %v3806_v57 = vld [vmem:[%s6599_s4 + $0x30] sm:$0xff]  ;;  %v3807_v58 = vld [vmem:[%s6599_s4 + $0x38] sm:$0xff] }
  0x62   : > { %4734 = vmatpush3.bf16.msra.mxu1 %v4731_v56 }
  0x65   : > { %2145 = vperm.xlu1 %4983, %v2078_v59   ;;  %2142 = vperm.xlu0 %4982, %v2077_v60   ;;  %v4735_v59 = vpack.c.bf16 %v3807_v58, %v3806_v57  ;;  %v761_v60 = vld [vmem:[%s6599_s4] sm:$0xff] }
  0x67   : > { %4736 = vmatprep.subr.bf16.mxu1 %v4735_v59 }
  0x68   : > { %4738 = vmatpush3.bf16.msra.mxu1 %v4735_v59 }
  0x69   : > { %2151 = vperm.xlu1 %4983, %v2080_v61   ;;  %2148 = vperm.xlu0 %4982, %v2079_v62   ;;  %v762_v61 = vld [vmem:[%s6599_s4 + $0x8] sm:$0xff] }
  0x6a   : > { %v4739_v62 = vpack.c.bf16 %v762_v61, %v761_v60 }
  0x6c   : > { %4740 = vmatprep.subr.bf16.mxu1 %v4739_v62 }
  0x9c   : > { %v462_v1 = vpop.permute.xlu1 %461  ;;  %v456_v2 = vpop.permute.xlu0 %455 }
  0x9d   : > { %vm502_vm2 = vcmp.eq.s32.totalorder %v456_v2, %v5267_v0  ;;  %vm504_vm3 = vcmp.eq.s32.totalorder %v462_v1, %v5267_v0  ;;  %v3952_v1 = vld [vmem:[%s6602_s7 + $0x10] sm:$0xff]  ;;  %v3953_v2 = vld [vmem:[%s6602_s7 + $0x18] sm:$0xff] }
  0x9e   : > { %v3771_v4 = vsel %vm502_vm2, 1.0, %v6609_v3  ;;  %v3773_v9 = vsel %vm504_vm3, 1.0, %v6609_v3 }
  0x9f   : > { %4318 = vmatprep.mubr.msk.f32.mxu0 %vm563_vm1, %v3771_v4  ;;  %v4783_v4 = vpack.c.bf16 %v3953_v2, %v3952_v1 }
  0xa0   : > { %v465_v7 = vpop.permute.xlu1 %464  ;;  %v459_v8 = vpop.permute.xlu0 %458 }
  0xa1   : > { %vm503_vm4 = vcmp.eq.s32.totalorder %v459_v8, %v5267_v0  ;;  %vm505_vm5 = vcmp.eq.s32.totalorder %v465_v7, %v5267_v0 }
  0xa2   : > { %v3772_v11 = vsel %vm503_vm4, 1.0, %v6609_v3  ;;  %v3774_v17 = vsel %vm505_vm5, 1.0, %v6609_v3  ;;  %vm2232_vm5 = vcmask 408576  }
  0xa3   : > { %4319 = vmatmul.mubr.msk.f32.vlgmr.msra.gmra.mrb[0].mxu0 %vm563_vm1, %v3772_v11 }
  0xa4   : > { %v471_v14 = vpop.permute.xlu1 %470  ;;  %4321 = vmatprep.mubr.msk.f32.mxu0 %vm563_vm1, %v3773_v9  ;;  %v468_v15 = vpop.permute.xlu0 %467  ;;  %4774 = vmatpush3.bf16.msra.mxu0 %v5232_v36 }
  0xa5   : > { %vm506_vm6 = vcmp.eq.s32.totalorder %v468_v15, %v5267_v0  ;;  %4776 = vmatprep.subr.bf16.mxu0 %v5281_v10  ;;  %vm507_vm7 = vcmp.eq.s32.totalorder %v471_v14, %v5267_v0 }
  0xa6   : > { %v3775_v18 = vsel %vm506_vm6, 1.0, %v6609_v3  ;;  %v3776_v21 = vsel %vm507_vm7, 1.0, %v6609_v3 }
  0xa7   : > { %4322 = vmatmul.mubr.msk.f32.gmra.mrb[2].mxu0 %vm563_vm1, %v3774_v17  ;;  %v763_v17 = vld [vmem:[%s6599_s4 + $0x10] sm:$0xff] }
  0xa8   : > { %v477_v19 = vpop.permute.xlu1 %476  ;;  %4324 = vmatprep.mubr.msk.f32.mxu0 %vm563_vm1, %v3775_v18  ;;  %v474_v20 = vpop.permute.xlu0 %473  ;;  %4778 = vmatpush3.bf16.msra.mxu0 %v5281_v10 }
  0xa9   : > { %vm508_vm8 = vcmp.eq.s32.totalorder %v474_v20, %v5267_v0  ;;  %4780 = vmatprep.subr.bf16.mxu0 %v5296_v16  ;;  %vm509_vm10 = vcmp.eq.s32.totalorder %v477_v19, %v5267_v0  ;;  %v764_v20 = vld [vmem:[%s6599_s4 + $0x18] sm:$0xff] }
  0xaa   : > { %v3777_v22 = vsel %vm508_vm8, 1.0, %v6609_v3  ;;  %v3778_v26 = vsel %vm509_vm10, 1.0, %v6609_v3 }
  0xab   : > { %4325 = vmatmul.mubr.msk.f32.gmra.mrb[4].mxu0 %vm563_vm1, %v3776_v21  ;;  %v3840_v21 = vld [vmem:[%s6599_s4 + $0x40] sm:$0xff] }
  0xac   : > { %v483_v24 = vpop.permute.xlu1 %482  ;;  %4327 = vmatprep.mubr.msk.f32.mxu0 %vm563_vm1, %v3777_v22  ;;  %v480_v25 = vpop.permute.xlu0 %479  ;;  %4782 = vmatpush3.bf16.msra.mxu0 %v5296_v16  ;;  %v3841_v22 = vld [vmem:[%s6599_s4 + $0x48] sm:$0xff] }
  0xad   : > { %vm510_vm11 = vcmp.eq.s32.totalorder %v480_v25, %v5267_v0  ;;  %4514 = vmatprep.subr.msk.mxu0 %vm2305_vm9, %v5311_v23  ;;  %vm511_vm12 = vcmp.eq.s32.totalorder %v483_v24, %v5267_v0 }
  0xae   : > { %v3779_v27 = vsel %vm510_vm11, 1.0, %v6609_v3  ;;  %v3780_v30 = vsel %vm511_vm12, 1.0, %v6609_v3  ;;  %vm783_vm11 = vcmp.lt.s32.totalorder %v5390_v5, 7  ;;  %vm805_vm12 = vcmask 261120  }
  0xaf   : > { %4328 = vmatmul.mubr.msk.f32.gmra.mrb[6].mxu0 %vm563_vm1, %v3778_v26 }
  0xb0   : > { %v489_v28 = vpop.permute.xlu1 %488  ;;  %4330 = vmatprep.mubr.msk.f32.mxu0 %vm563_vm1, %v3779_v27  ;;  %v486_v29 = vpop.permute.xlu0 %485  ;;  %4515 = vmatpush3.msk.msra.mxu0 %vm2305_vm9, %v5311_v23 }
  0xb1   : > { %vm512_vm13 = vcmp.eq.s32.totalorder %v486_v29, %v5267_v0  ;;  %vm513_vm14 = vcmp.eq.s32.totalorder %v489_v28, %v5267_v0  ;;  %4784 = vmatprep.subr.bf16.mxu0 %v4783_v4 }
  0xb2   : > { %v3781_v31 = vsel %vm512_vm13, 1.0, %v6609_v3  ;;  %v3782_v34 = vsel %vm513_vm14, 1.0, %v6609_v3  ;;  %vm1208_vm13 = vcmp.lt.s32.totalorder %v5390_v5, 6  ;;  %vm1455_vm14 = vcmp.lt.s32.totalorder %v5390_v5, 5 }
  0xb3   : > { %4331 = vmatmul.mubr.msk.f32.gmra.mrb[8].mxu0 %vm563_vm1, %v3780_v30 }
  0xb4   : > { %v495_v32 = vpop.permute.xlu1 %494  ;;  %4333 = vmatprep.mubr.msk.f32.mxu0 %vm563_vm1, %v3781_v31  ;;  %v492_v33 = vpop.permute.xlu0 %491 }
  0xb5   : > { %vm514_vm15 = vcmp.eq.s32.totalorder %v492_v33, %v5267_v0  ;;  %vm515_vm0 = vcmp.eq.s32.totalorder %v495_v32, %v5267_v0 }
  0xb6   : > { %v3783_v35 = vsel %vm514_vm15, 1.0, %v6609_v3  ;;  %v3784_v39 = vsel %vm515_vm0, 1.0, %v6609_v3  ;;  %vm1702_vm15 = vcmp.lt.s32.totalorder %v5390_v5, 4  ;;  %vm2547_vm0 = vcmask 130048  }
  0xb7   : > { %4334 = vmatmul.mubr.msk.f32.gmra.mrb[10].mxu0 %vm563_vm1, %v3782_v34 }
  0xb8   : > { %v501_v37 = vpop.permute.xlu1 %500  ;;  %4336 = vmatprep.mubr.msk.f32.mxu0 %vm563_vm1, %v3783_v35  ;;  %v498_v38 = vpop.permute.xlu0 %497  ;;  %v4743_v35 = vpack.c.bf16 %v764_v20, %v763_v17 }
  0xb9   : > { %vm516_vm2 = vcmp.eq.s32.totalorder %v498_v38, %v5267_v0  ;;  %vm517_vm3 = vcmp.eq.s32.totalorder %v501_v37, %v5267_v0  ;;  %v5454_v37 = vpack.c.bf16 %v3841_v22, %v3840_v21 }
  0xba   : > { %v3785_v40 = vsel %vm516_vm2, 1.0, %v6609_v3  ;;  %v3786_v43 = vsel %vm517_vm3, 1.0, %v6609_v3 }
  0xbb   : > { %4337 = vmatmul.mubr.msk.f32.gmra.mrb[12].mxu0 %vm563_vm1, %v3784_v39 }
  0xbc   : > { %v2086_v41 = vpop.permute.xlu1 %2085  ;;  %4339 = vmatprep.mubr.msk.f32.mxu0 %vm563_vm1, %v3785_v40  ;;  %v2083_v42 = vpop.permute.xlu0 %2082 }
  0xbd   : > { %vm2153_vm4 = vcmp.eq.s32.totalorder %v2083_v42, %v5267_v0  ;;  %vm2154_vm6 = vcmp.eq.s32.totalorder %v2086_v41, %v5267_v0 }
  0xbe   : > { %v3903_v44 = vsel %vm2153_vm4, 1.0, %v6609_v3  ;;  %v3904_v47 = vsel %vm2154_vm6, 1.0, %v6609_v3 }
  0xbf   : > { %4340 = vmatmul.mubr.msk.f32.gmra.mrb[14].mxu0 %vm563_vm1, %v3786_v43 }
  0xc0   : > { %v2092_v45 = vpop.permute.xlu1 %2091  ;;  %4516 = vmatprep.mubr.msk.f32.mxu0 %vm2232_vm5, %v3903_v44  ;;  %v2089_v46 = vpop.permute.xlu0 %2088 }
  0xc1   : > { %vm2155_vm7 = vcmp.eq.s32.totalorder %v2089_v46, %v5267_v0  ;;  %vm2156_vm8 = vcmp.eq.s32.totalorder %v2092_v45, %v5267_v0 }
  0xc2   : > { %v3905_v48 = vsel %vm2155_vm7, 1.0, %v6609_v3  ;;  %v3906_v51 = vsel %vm2156_vm8, 1.0, %v6609_v3 }
  0xc3   : > { %4517 = vmatmul.mubr.msk.f32.vlgmr.msra.gmra.mrb[16].mxu0 %vm2232_vm5, %v3904_v47 }
  0xc4   : > { %v2098_v49 = vpop.permute.xlu1 %2097  ;;  %4519 = vmatprep.mubr.msk.f32.mxu0 %vm2232_vm5, %v3905_v48  ;;  %v2095_v50 = vpop.permute.xlu0 %2094  ;;  %4786 = vmatpush3.bf16.msra.mxu0 %v4783_v4 }
  0xc5   : > { %vm2157_vm1 = vcmp.eq.s32.totalorder %v2095_v50, %v5267_v0  ;;  %vm2158_vm10 = vcmp.eq.s32.totalorder %v2098_v49, %v5267_v0 }
  0xc6   : > { %v3907_v52 = vsel %vm2157_vm1, 1.0, %v6609_v3  ;;  %v3908_v53 = vsel %vm2158_vm10, 1.0, %v6609_v3 }
  0xc7   : > { %4520 = vmatmul.mubr.msk.f32.gmra.mrb[18].mxu0 %vm2232_vm5, %v3906_v51 }
  0xc8   : > { %4522 = vmatprep.mubr.msk.f32.mxu0 %vm2232_vm5, %v3907_v52 }
  0xcb   : > { %4523 = vmatmul.mubr.msk.f32.gmra.mrb[20].mxu0 %vm2232_vm5, %v3908_v53 }
 0x176   : > { %v5393_v6 = vpop.f32.mrb[0].mxu0 }
 0x177   : > { %v5398_v7 = vpop.f32.mrb[1].mxu0  ;;  %v766_v8 = vrot.slane %v5393_v6, 1  ;;  %v1193_v9 = vrot.slane %v5393_v6, 2  ;;  %v1440_v63 = vrot.slane %v5393_v6, 3  ;;  %v1687_v11 = vrot.slane %v5393_v6, 4 }
 0x178   : > { %v6614_v12 = vrot.slane %v5398_v7, 1  ;;  %v6613_v13 = vrot.slane %v5398_v7, 2  ;;  %v6612_v14 = vrot.slane %v5398_v7, 3  ;;  %v6611_v15 = vrot.slane %v5398_v7, 4 }
 0x179   : > { %v6652_v10 = vrot.slane %v5398_v7, 1 }
 0x17a   : > { %v5411_v18 = vpop.f32.mrb[2].mxu0  ;;  %v798_v19 = vsel %vm783_vm11, %v6614_v12, %v766_v8  ;;  %v5430_v24 = vsel %vm1208_vm13, %v6613_v13, %v1193_v9  ;;  %v5436_v25 = vsel %vm1455_vm14, %v6612_v14, %v1440_v63  ;;  %v5442_v26 = vsel %vm1702_vm15, %v6611_v15, %v1687_v11 }
 0x17b   : > { %6640 = vst [vmem:[#allocation11_spill] sm:$0xff] %v5442_v26  ;;  %v5444_v27 = vpop.f32.mrb[3].mxu0  ;;  %4350 = vmatprep.mubr.msk.f32.mxu1 %vm805_vm12, %v798_v19  ;;  %v768_v28 = vrot.slane %v5411_v18, 1  ;;  %v1195_v29 = vrot.slane %v5411_v18, 2  ;;  %v1442_v30 = vrot.slane %v5411_v18, 3  ;;  %v1689_v38 = vrot.slane %v5411_v18, 4 }
 0x17c   : > { %v1194_v31 = vrot.slane %v5444_v27, 2  ;;  %v1441_v32 = vrot.slane %v5444_v27, 3  ;;  %v767_v33 = vrot.slane %v5444_v27, 1  ;;  %v1688_v34 = vrot.slane %v5444_v27, 4 }
 0x17e   : > { %v5457_v39 = vpop.f32.mrb[4].mxu0  ;;  %v797_v40 = vsel %vm783_vm11, %v766_v8, %v767_v33  ;;  %v796_v41 = vsel %vm783_vm11, %v767_v33, %v768_v28  ;;  %v5465_v42 = vsel %vm1208_vm13, %v1193_v9, %v1194_v31  ;;  %v5469_v43 = vsel %vm1208_vm13, %v1194_v31, %v1195_v29 }
 0x17f   : > { %v5471_v44 = vpop.f32.mrb[5].mxu0  ;;  %4351 = vmatmul.mubr.msk.f32.vlgmr.msra.gmra.mrb[0].mxu1 %vm805_vm12, %v797_v40  ;;  %v770_v45 = vrot.slane %v5457_v39, 1  ;;  %v1197_v46 = vrot.slane %v5457_v39, 2  ;;  %v5478_v47 = vsel %vm1455_vm14, %v1440_v63, %v1441_v32  ;;  %v5482_v48 = vsel %vm1455_vm14, %v1441_v32, %v1442_v30 }
 0x180   : > { %4742 = vmatpush3.bf16.msra.mxu1 %v4739_v62  ;;  %4353 = vmatprep.mubr.msk.f32.mxu1 %vm805_vm12, %v796_v41  ;;  %v769_v49 = vrot.slane %v5471_v44, 1  ;;  %v1196_v50 = vrot.slane %v5471_v44, 2  ;;  %v1443_v51 = vrot.slane %v5471_v44, 3  ;;  %v1444_v52 = vrot.slane %v5457_v39, 3 }
 0x181   : > { %4744 = vmatprep.subr.bf16.mxu1 %v4743_v35  ;;  %v5491_v53 = vsel %vm1702_vm15, %v1687_v11, %v1688_v34  ;;  %v5495_v54 = vsel %vm1702_vm15, %v1688_v34, %v1689_v38  ;;  %v1690_v55 = vrot.slane %v5471_v44, 4  ;;  %v1691_v56 = vrot.slane %v5457_v39, 4 }
 0x182   : > { %6641 = vst [vmem:[#allocation12_spill] sm:$0xff] %v5491_v53  ;;  %6642 = vst [vmem:[#allocation13_spill] sm:$0xff] %v5495_v54  ;;  %v5499_v57 = vpop.f32.mrb[6].mxu0  ;;  %v795_v58 = vsel %vm783_vm11, %v768_v28, %v769_v49  ;;  %v794_v59 = vsel %vm783_vm11, %v769_v49, %v770_v45  ;;  %v5507_v60 = vsel %vm1208_vm13, %v1195_v29, %v1196_v50  ;;  %v6653_v54 = vrot.slane %v5398_v7, 2 }
 0x183   : > { %v5511_v61 = vsel %vm1208_vm13, %v1196_v50, %v1197_v46  ;;  %v5513_v62 = vpop.f32.mrb[7].mxu0  ;;  %4354 = vmatmul.mubr.msk.f32.gmra.mrb[2].mxu1 %vm805_vm12, %v795_v58  ;;  %v772_v1 = vrot.slane %v5499_v57, 1  ;;  %v1199_v2 = vrot.slane %v5499_v57, 2  ;;  %v5520_v4 = vsel %vm1455_vm14, %v1442_v30, %v1443_v51 }
 0x184   : > { %v5524_v8 = vsel %vm1455_vm14, %v1443_v51, %v1444_v52  ;;  %4356 = vmatprep.mubr.msk.f32.mxu1 %vm805_vm12, %v794_v59  ;;  %v771_v9 = vrot.slane %v5513_v62, 1  ;;  %4746 = vmatpush3.bf16.msra.mxu1 %v4743_v35  ;;  %v1198_v63 = vrot.slane %v5513_v62, 2  ;;  %v1445_v11 = vrot.slane %v5513_v62, 3 }
 0x185   : > { %v1446_v17 = vrot.slane %v5499_v57, 3  ;;  %4748 = vmatprep.subr.bf16.mxu1 %v5454_v37  ;;  %v5534_v19 = vsel %vm1702_vm15, %v1689_v38, %v1690_v55  ;;  %v5538_v20 = vsel %vm1702_vm15, %v1690_v55, %v1691_v56  ;;  %v1692_v21 = vrot.slane %v5513_v62, 4 }
 0x186   : > { %6643 = vst [vmem:[#allocation14_spill] sm:$0xff] %v5534_v19  ;;  %6644 = vst [vmem:[#allocation15_spill] sm:$0xff] %v5538_v20  ;;  %v1693_v22 = vrot.slane %v5499_v57, 4  ;;  %v5542_v28 = vpop.f32.mrb[8].mxu0  ;;  %v793_v29 = vsel %vm783_vm11, %v770_v45, %v771_v9  ;;  %v792_v30 = vsel %vm783_vm11, %v771_v9, %v772_v1  ;;  %v5550_v31 = vsel %vm1208_vm13, %v1197_v46, %v1198_v63 }
 0x187   : > { %v5554_v32 = vsel %vm1208_vm13, %v1198_v63, %v1199_v2  ;;  %v5556_v33 = vpop.f32.mrb[9].mxu0  ;;  %4357 = vmatmul.mubr.msk.f32.gmra.mrb[4].mxu1 %vm805_vm12, %v793_v29  ;;  %v774_v34 = vrot.slane %v5542_v28, 1  ;;  %v1201_v35 = vrot.slane %v5542_v28, 2  ;;  %v5563_v38 = vsel %vm1455_vm14, %v1444_v52, %v1445_v11 }
 0x188   : > { %v5567_v40 = vsel %vm1455_vm14, %v1445_v11, %v1446_v17  ;;  %4359 = vmatprep.mubr.msk.f32.mxu1 %vm805_vm12, %v792_v30  ;;  %v773_v41 = vrot.slane %v5556_v33, 1  ;;  %v1200_v45 = vrot.slane %v5556_v33, 2  ;;  %v1447_v46 = vrot.slane %v5556_v33, 3 }
 0x189   : > { %v1448_v49 = vrot.slane %v5542_v28, 3  ;;  %v5576_v50 = vsel %vm1702_vm15, %v1691_v56, %v1692_v21  ;;  %v5580_v51 = vsel %vm1702_vm15, %v1692_v21, %v1693_v22  ;;  %v1694_v52 = vrot.slane %v5556_v33, 4 }
 0x18a   : > { %6645 = vst [vmem:[#allocation16_spill] sm:$0xff] %v5576_v50  ;;  %6646 = vst [vmem:[#allocation17_spill] sm:$0xff] %v5580_v51  ;;  %v1695_v55 = vrot.slane %v5542_v28, 4  ;;  %v5584_v58 = vpop.f32.mrb[10].mxu0  ;;  %v791_v59 = vsel %vm783_vm11, %v772_v1, %v773_v41  ;;  %v790_v9 = vsel %vm783_vm11, %v773_v41, %v774_v34  ;;  %v5592_v56 = vsel %vm1208_vm13, %v1199_v2, %v1200_v45 }
 0x18b   : > { %v5596_v63 = vsel %vm1208_vm13, %v1200_v45, %v1201_v35  ;;  %v5598_v11 = vpop.f32.mrb[11].mxu0  ;;  %4360 = vmatmul.mubr.msk.f32.gmra.mrb[6].mxu1 %vm805_vm12, %v791_v59  ;;  %v776_v21 = vrot.slane %v5584_v58, 1  ;;  %v1203_v29 = vrot.slane %v5584_v58, 2  ;;  %v5605_v1 = vsel %vm1455_vm14, %v1446_v17, %v1447_v46 }
 0x18c   : > { %v5609_v2 = vsel %vm1455_vm14, %v1447_v46, %v1448_v49  ;;  %4362 = vmatprep.mubr.msk.f32.mxu1 %vm805_vm12, %v790_v9  ;;  %v775_v30 = vrot.slane %v5598_v11, 1  ;;  %v1202_v41 = vrot.slane %v5598_v11, 2  ;;  %v1449_v45 = vrot.slane %v5598_v11, 3 }
 0x18d   : > { %v1450_v59 = vrot.slane %v5584_v58, 3  ;;  %v5618_v3 = vsel %vm1702_vm15, %v1693_v22, %v1694_v52  ;;  %v5622_v17 = vsel %vm1702_vm15, %v1694_v52, %v1695_v55  ;;  %v1696_v46 = vrot.slane %v5598_v11, 4 }
 0x18e   : > { %6647 = vst [vmem:[#allocation18_spill] sm:$0xff] %v5618_v3  ;;  %6648 = vst [vmem:[#allocation19_spill] sm:$0xff] %v5622_v17  ;;  %v1697_v9 = vrot.slane %v5584_v58, 4  ;;  %v5626_v15 = vpop.f32.mrb[12].mxu0  ;;  %v789_v14 = vsel %vm783_vm11, %v774_v34, %v775_v30  ;;  %v788_v13 = vsel %vm783_vm11, %v775_v30, %v776_v21  ;;  %v5634_v22 = vsel %vm1208_vm13, %v1201_v35, %v1202_v41 }
 0x18f   : > { %v5638_v52 = vsel %vm1208_vm13, %v1202_v41, %v1203_v29  ;;  %v5640_v12 = vpop.f32.mrb[13].mxu0  ;;  %4363 = vmatmul.mubr.msk.f32.gmra.mrb[8].mxu1 %vm805_vm12, %v789_v14  ;;  %v778_v0 = vrot.slane %v5626_v15, 1  ;;  %v1205_v17 = vrot.slane %v5626_v15, 2  ;;  %v5647_v34 = vsel %vm1455_vm14, %v1448_v49, %v1449_v45 }
 0x190   : > { %v5651_v35 = vsel %vm1455_vm14, %v1449_v45, %v1450_v59  ;;  %4365 = vmatprep.mubr.msk.f32.mxu1 %vm805_vm12, %v788_v13  ;;  %v777_v30 = vrot.slane %v5640_v12, 1  ;;  %v1204_v41 = vrot.slane %v5640_v12, 2  ;;  %v1451_v14 = vrot.slane %v5640_v12, 3 }
 0x191   : > { %v1452_v3 = vrot.slane %v5626_v15, 3  ;;  %v5660_v23 = vsel %vm1702_vm15, %v1695_v55, %v1696_v46  ;;  %v5664_v49 = vsel %vm1702_vm15, %v1696_v46, %v1697_v9  ;;  %v1698_v45 = vrot.slane %v5640_v12, 4 }
 0x192   : > { %6649 = vst [vmem:[#allocation20_spill] sm:$0xff] %v5660_v23  ;;  %6650 = vst [vmem:[#allocation21_spill] sm:$0xff] %v5664_v49  ;;  %v1699_v13 = vrot.slane %v5626_v15, 4  ;;  %v5668_v51 = vpop.f32.mrb[14].mxu0  ;;  %v787_v50 = vsel %vm783_vm11, %v776_v21, %v777_v30  ;;  %v786_v16 = vsel %vm783_vm11, %v777_v30, %v778_v0  ;;  %v5676_v55 = vsel %vm1208_vm13, %v1203_v29, %v1204_v41 }
 0x193   : > { %v5680_v46 = vsel %vm1208_vm13, %v1204_v41, %v1205_v17  ;;  %v5682_v49 = vpop.f32.mrb[15].mxu0  ;;  %4366 = vmatmul.mubr.msk.f32.gmra.mrb[10].mxu1 %vm805_vm12, %v787_v50  ;;  %v780_v23 = vrot.slane %v5668_v51, 1  ;;  %v1207_v20 = vrot.slane %v5668_v51, 2  ;;  %v5689_v21 = vsel %vm1455_vm14, %v1450_v59, %v1451_v14 }
 0x194   : > { %v5693_v29 = vsel %vm1455_vm14, %v1451_v14, %v1452_v3  ;;  %4368 = vmatprep.mubr.msk.f32.mxu1 %vm805_vm12, %v786_v16  ;;  %v779_v30 = vrot.slane %v5682_v49, 1  ;;  %v1206_v41 = vrot.slane %v5682_v49, 2  ;;  %v1453_v50 = vrot.slane %v5682_v49, 3 }
 0x195   : > { %6651 = vst [vmem:[#allocation22_spill] sm:$0xff] %v5693_v29  ;;  %v1454_v19 = vrot.slane %v5668_v51, 3  ;;  %v799_v59 = vsel %vm783_vm11, %v780_v23, %v6652_v10  ;;  %v5708_v14 = vsel %vm1208_vm13, %v1207_v20, %v6653_v54  ;;  %v5712_v16 = vsel %vm1702_vm15, %v1697_v9, %v1698_v45 }
 0x196   : > { %6654 = vst [vmem:[#allocation23_spill] sm:$0xff] %v5712_v16  ;;  %v5716_v53 = vsel %vm1702_vm15, %v1698_v45, %v1699_v13  ;;  %v5718_v26 = vpop.f32.mrb[16].mxu0  ;;  %v785_v29 = vsel %vm783_vm11, %v778_v0, %v779_v30  ;;  %v784_v10 = vsel %vm783_vm11, %v779_v30, %v780_v23  ;;  %v5726_v54 = vsel %vm1208_vm13, %v1205_v17, %v1206_v41 }
 0x197   : > { %6655 = vst [vmem:[#allocation24_spill] sm:$0xff] %v5716_v53  ;;  %6656 = vst [vmem:[#allocation25_spill] sm:$0xff] %v5718_v26  ;;  %v5730_v9 = vsel %vm1208_vm13, %v1206_v41, %v1207_v20  ;;  %v2497_v16 = vrot.slane %v5718_v26, 1  ;;  %v3063_v45 = vrot.slane %v5718_v26, 2  ;;  %4369 = vmatmul.mubr.msk.f32.gmra.mrb[12].mxu1 %vm805_vm12, %v785_v29  ;;  %v5735_v53 = vpop.f32.mrb[17].mxu0  ;;  %v5739_v0 = vsel %vm1455_vm14, %v1452_v3, %v1453_v50 }
 0x198   : > { %6657 = vst [vmem:[#allocation26_spill] sm:$0xff] %v5735_v53  ;;  %6658 = vst [vmem:[#allocation27_spill] sm:$0xff] %v5739_v0  ;;  %v5743_v23 = vsel %vm1455_vm14, %v1453_v50, %v1454_v19  ;;  %v6624_v17 = vrot.slane %v5735_v53, 1  ;;  %v6627_v20 = vrot.slane %v5735_v53, 2  ;;  %4371 = vmatprep.mubr.msk.f32.mxu1 %vm805_vm12, %v784_v10  ;;  %v6660_v30 = vrot.slane %v5398_v7, 3  ;;  %v3842_v10 = vld [vmem:[%s6599_s4 + $0x50] sm:$0xff] }
 0x199   : > { %6659 = vst [vmem:[#allocation28_spill] sm:$0xff] %v5743_v23  ;;  %v1700_v41 = vrot.slane %v5682_v49, 4  ;;  %v1701_v3 = vrot.slane %v5668_v51, 4  ;;  %v6665_v53 = vrot.slane %v5398_v7, 4 }
 0x19a   : > { %v5752_v29 = vsel %vm1455_vm14, %v1454_v19, %v6660_v30  ;;  %v5756_v26 = vpop.f32.mrb[18].mxu0  ;;  %v2542_v50 = vsel %vm783_vm11, %v6624_v17, %v2497_v16  ;;  %v3843_v19 = vld [vmem:[%s6599_s4 + $0x58] sm:$0xff] }
 0x19b   : > { %6661 = vst [vmem:[#allocation29_spill] sm:$0xff] %v5752_v29  ;;  %6662 = vst [vmem:[#allocation30_spill] sm:$0xff] %v5756_v26  ;;  %v5770_v30 = vsel %vm1702_vm15, %v1699_v13, %v1700_v41  ;;  %v5776_v29 = vsel %vm1208_vm13, %v6627_v20, %v3063_v45  ;;  %v2499_v17 = vrot.slane %v5756_v26, 1  ;;  %v3065_v23 = vrot.slane %v5756_v26, 2  ;;  %4372 = vmatmul.mubr.msk.f32.gmra.mrb[14].mxu1 %vm805_vm12, %v799_v59  ;;  %v5781_v0 = vpop.f32.mrb[19].mxu0 }
 0x19c   : > { %6663 = vst [vmem:[#allocation31_spill] sm:$0xff] %v5776_v29  ;;  %4556 = vmatprep.mubr.msk.f32.mxu0 %vm2547_vm0, %v2542_v50  ;;  %v5786_v13 = vsel %vm1702_vm15, %v1700_v41, %v1701_v3  ;;  %v5792_v20 = vsel %vm1702_vm15, %v1701_v3, %v6665_v53  ;;  %v2498_v29 = vrot.slane %v5781_v0, 1  ;;  %v3064_v26 = vrot.slane %v5781_v0, 2  ;;  %4382 = vmatprep.mubr.msk.f32.mxu1 %vm805_vm12, %v5398_v7  ;;  %v3860_v3 = vld [vmem:[%s6599_s4 + $0x60] sm:$0xff]  ;;  %v3861_v7 = vld [vmem:[%s6599_s4 + $0x68] sm:$0xff] }
 0x19d   : > { %6664 = vst [vmem:[#allocation32_spill] sm:$0xff] %v5786_v13  ;;  %v4751_v59 = vpack.c.bf16 %v3843_v19, %v3842_v10 }
 0x19e   : > { %v2541_v50 = vsel %vm783_vm11, %v2497_v16, %v2498_v29  ;;  %v5802_v41 = vsel %vm1208_vm13, %v3063_v45, %v3064_v26  ;;  %v5804_v13 = vpop.f32.mrb[20].mxu0  ;;  %v2540_v53 = vsel %vm783_vm11, %v2498_v29, %v2499_v17  ;;  %v5816_v16 = vsel %vm1208_vm13, %v3064_v26, %v3065_v23 }
 0x19f   : > { %6666 = vst [vmem:[#allocation33_spill] sm:$0xff] %v5802_v41  ;;  %v2501_v45 = vrot.slane %v5804_v13, 1  ;;  %v3067_v10 = vrot.slane %v5804_v13, 2  ;;  %4383 = vmatmul.mubr.msk.f32.vlgmr.msra.gmra.mrb[0].mxu1 %vm805_vm12, %v5393_v6  ;;  %v5822_v29 = vpop.f32.mrb[21].mxu0  ;;  %4557 = vmatmul.mubr.msk.f32.vlgmr.msra.gmra.mrb[22].mxu0 %vm2547_vm0, %v2541_v50  ;;  %v4755_v26 = vpack.c.bf16 %v3861_v7, %v3860_v3 }
 0x1a0   : > { %4750 = vmatpush3.bf16.msra.mxu1 %v5454_v37  ;;  %v2500_v19 = vrot.slane %v5822_v29, 1  ;;  %v3066_v41 = vrot.slane %v5822_v29, 2  ;;  %4385 = vmatprep.mubr.msk.f32.mxu1 %vm805_vm12, %v5444_v27 }
 0x1a1   : > { %4559 = vmatprep.mubr.msk.f32.mxu0 %vm2547_vm0, %v2540_v53  ;;  %4752 = vmatprep.subr.bf16.mxu1 %v4751_v59 }
 0x1a2   : > { %v2539_v6 = vsel %vm783_vm11, %v2499_v17, %v2500_v19  ;;  %v2538_v50 = vsel %vm783_vm11, %v2500_v19, %v2501_v45  ;;  %v5839_v37 = vsel %vm1208_vm13, %v3065_v23, %v3066_v41  ;;  %v5845_v27 = vsel %vm1208_vm13, %v3066_v41, %v3067_v10 }
 0x1a3   : > { %4386 = vmatmul.mubr.msk.f32.gmra.mrb[2].mxu1 %vm805_vm12, %v5411_v18  ;;  %4560 = vmatmul.mubr.msk.f32.gmra.mrb[24].mxu0 %vm2547_vm0, %v2539_v6  ;;  %v3862_v18 = vld [vmem:[%s6599_s4 + $0x70] sm:$0xff] }
 0x1a4   : > { %4388 = vmatprep.mubr.msk.f32.mxu1 %vm805_vm12, %v5471_v44  ;;  %4562 = vmatprep.mubr.msk.f32.mxu0 %vm2547_vm0, %v2538_v50  ;;  %v3881_v44 = vld [vmem:[%s6599_s4 + $0x88] sm:$0xff] }
 0x1a5   : > { %4754 = vmatpush3.bf16.msra.mxu1 %v4751_v59 }
 0x1a6   : > { %4756 = vmatprep.subr.bf16.mxu1 %v4755_v26 }
 0x1a7   : > { %4389 = vmatmul.mubr.msk.f32.gmra.mrb[4].mxu1 %vm805_vm12, %v5457_v39  ;;  %v3863_v39 = vld [vmem:[%s6599_s4 + $0x78] sm:$0xff] }
 0x1a8   : > { %4391 = vmatprep.mubr.msk.f32.mxu1 %vm805_vm12, %v5513_v62  ;;  %v6672_v62 = vld [vmem:[#allocation12_spill] sm:$0xff] }
 0x1ab   : > { %4392 = vmatmul.mubr.msk.f32.gmra.mrb[6].mxu1 %vm805_vm12, %v5499_v57 }
 0x1ac   : > { %4394 = vmatprep.mubr.msk.f32.mxu1 %vm805_vm12, %v5556_v33  ;;  %v6677_v33 = vld [vmem:[#allocation9_spill] sm:$0xff] }
 0x1af   : > { %4395 = vmatmul.mubr.msk.f32.gmra.mrb[8].mxu1 %vm805_vm12, %v5542_v28  ;;  %v6675_v28 = vld [vmem:[#allocation14_spill] sm:$0xff] }
 0x1b0   : > { %4397 = vmatprep.mubr.msk.f32.mxu1 %vm805_vm12, %v5598_v11 }
 0x1b3   : > { %4398 = vmatmul.mubr.msk.f32.gmra.mrb[10].mxu1 %vm805_vm12, %v5584_v58 }
 0x1b4   : > { %4400 = vmatprep.mubr.msk.f32.mxu1 %vm805_vm12, %v5640_v12  ;;  %v4759_v12 = vpack.c.bf16 %v3863_v39, %v3862_v18 }
 0x1b7   : > { %4401 = vmatmul.mubr.msk.f32.gmra.mrb[12].mxu1 %vm805_vm12, %v5626_v15  ;;  %v3880_v15 = vld [vmem:[%s6599_s4 + $0x80] sm:$0xff] }
 0x1b8   : > { %4403 = vmatprep.mubr.msk.f32.mxu1 %vm805_vm12, %v5682_v49  ;;  %v4763_v57 = vpack.c.bf16 %v3881_v44, %v3880_v15 }
 0x1bb   : > { %4404 = vmatmul.mubr.msk.f32.gmra.mrb[14].mxu1 %vm805_vm12, %v5668_v51  ;;  %v6680_v51 = vld [vmem:[#allocation10_spill] sm:$0xff] }
 0x1bc   : > { %4414 = vmatprep.mubr.msk.f32.mxu1 %vm805_vm12, %v5430_v24  ;;  %v3882_v24 = vld [vmem:[%s6599_s4 + $0x90] sm:$0xff] }
 0x1bf   : > { %4415 = vmatmul.mubr.msk.f32.vlgmr.msra.gmra.mrb[0].mxu1 %vm805_vm12, %v5465_v42  ;;  %v3883_v42 = vld [vmem:[%s6599_s4 + $0x98] sm:$0xff] }
 0x1c0   : > { %4758 = vmatpush3.bf16.msra.mxu1 %v4755_v26  ;;  %4417 = vmatprep.mubr.msk.f32.mxu1 %vm805_vm12, %v5469_v43  ;;  %v4767_v43 = vpack.c.bf16 %v3883_v42, %v3882_v24 }
 0x1c1   : > { %4760 = vmatprep.subr.bf16.mxu1 %v4759_v12 }
 0x1c3   : > { %4418 = vmatmul.mubr.msk.f32.gmra.mrb[2].mxu1 %vm805_vm12, %v5507_v60  ;;  %v6670_v60 = vld [vmem:[#allocation29_spill] sm:$0xff] }
 0x1c4   : > { %4420 = vmatprep.mubr.msk.f32.mxu1 %vm805_vm12, %v5511_v61  ;;  %4762 = vmatpush3.bf16.msra.mxu1 %v4759_v12  ;;  %v6671_v61 = vld [vmem:[#allocation11_spill] sm:$0xff] }
 0x1c5   : > { %4764 = vmatprep.subr.bf16.mxu1 %v4763_v57 }
 0x1c7   : > { %4421 = vmatmul.mubr.msk.f32.gmra.mrb[4].mxu1 %vm805_vm12, %v5550_v31  ;;  %v6676_v31 = vld [vmem:[#allocation15_spill] sm:$0xff] }
 0x1c8   : > { %4423 = vmatprep.mubr.msk.f32.mxu1 %vm805_vm12, %v5554_v32  ;;  %v2101_v32 = vpop.permute.xlu0 %2100 }
 0x1cb   : > { %4424 = vmatmul.mubr.msk.f32.gmra.mrb[6].mxu1 %vm805_vm12, %v5592_v56  ;;  %v6681_v56 = vld [vmem:[#allocation18_spill] sm:$0xff] }
 0x1cc   : > { %4426 = vmatprep.mubr.msk.f32.mxu1 %vm805_vm12, %v5596_v63  ;;  %v2107_v58 = vpop.permute.xlu0 %2106  ;;  %v6682_v63 = vld [vmem:[#allocation19_spill] sm:$0xff] }
 0x1cf   : > { %4427 = vmatmul.mubr.msk.f32.gmra.mrb[8].mxu1 %vm805_vm12, %v5634_v22 }
 0x1d0   : > { %4429 = vmatprep.mubr.msk.f32.mxu1 %vm805_vm12, %v5638_v52  ;;  %v2113_v22 = vpop.permute.xlu0 %2112  ;;  %v6685_v52 = vld [vmem:[#allocation23_spill] sm:$0xff] }
 0x1d3   : > { %4430 = vmatmul.mubr.msk.f32.gmra.mrb[10].mxu1 %vm805_vm12, %v5676_v55  ;;  %v6687_v55 = vld [vmem:[#allocation7_spill] sm:$0xff] }
 0x1d4   : > { %4432 = vmatprep.mubr.msk.f32.mxu1 %vm805_vm12, %v5680_v46  ;;  %v2119_v49 = vpop.permute.xlu0 %2118  ;;  %v6688_v46 = vld [vmem:[#allocation32_spill] sm:$0xff]  ;;  %vm2161_vm3 = vcmp.eq.s32.totalorder %v2107_v58, %v6687_v55  ;;  %vm2163_vm6 = vcmp.eq.s32.totalorder %v2113_v22, %v6687_v55 }
 0x1d5   : > { %vm2165_vm8 = vcmp.eq.s32.totalorder %v2119_v49, %v6687_v55 }
 0x1d7   : > { %4433 = vmatmul.mubr.msk.f32.gmra.mrb[12].mxu1 %vm805_vm12, %v5726_v54 }
 0x1d8   : > { %4435 = vmatprep.mubr.msk.f32.mxu1 %vm805_vm12, %v5730_v9  ;;  %v2125_v9 = vpop.permute.xlu0 %2124 }
 0x1d9   : > { %vm2167_vm10 = vcmp.eq.s32.totalorder %v2125_v9, %v6687_v55 }
 0x1db   : > { %4436 = vmatmul.mubr.msk.f32.gmra.mrb[14].mxu1 %vm805_vm12, %v5708_v14  ;;  %v6689_v14 = vmov 0.0  }
 0x1dc   : > { %4446 = vmatprep.mubr.msk.f32.mxu1 %vm805_vm12, %v5436_v25  ;;  %v6667_v25 = vld [vmem:[#allocation22_spill] sm:$0xff]  ;;  %v3911_v17 = vsel %vm2161_vm3, 1.0, %v6689_v14  ;;  %v3913_v59 = vsel %vm2163_vm6, 1.0, %v6689_v14  ;;  %v2131_v41 = vpop.permute.xlu0 %2130  ;;  %v3915_v7 = vsel %vm2165_vm8, 1.0, %v6689_v14  ;;  %v3917_v6 = vsel %vm2167_vm10, 1.0, %v6689_v14 }
 0x1dd   : > { %vm2169_vm14 = vcmp.eq.s32.totalorder %v2131_v41, %v6687_v55  ;;  %vm3592_vm10 = vcmask 1041409  }
 0x1de   : > { %v3919_v39 = vsel %vm2169_vm14, 1.0, %v6689_v14  ;;  %vm3596_vm14 = vcmask 1043459  }
 0x1df   : > { %4447 = vmatmul.mubr.msk.f32.vlgmr.msra.gmra.mrb[0].mxu1 %vm805_vm12, %v5478_v47  ;;  %v6668_v47 = vld [vmem:[#allocation27_spill] sm:$0xff] }
 0x1e0   : > { %4766 = vmatpush3.bf16.msra.mxu1 %v4763_v57  ;;  %4449 = vmatprep.mubr.msk.f32.mxu1 %vm805_vm12, %v5482_v48  ;;  %v6669_v48 = vld [vmem:[#allocation28_spill] sm:$0xff]  ;;  %v2137_v19 = vpop.permute.xlu0 %2136 }
 0x1e1   : > { %4768 = vmatprep.subr.bf16.mxu1 %v4767_v43 }
 0x1e3   : > { %4450 = vmatmul.mubr.msk.f32.gmra.mrb[2].mxu1 %vm805_vm12, %v5520_v4  ;;  %v6673_v4 = vld [vmem:[#allocation13_spill] sm:$0xff] }
 0x1e4   : > { %4452 = vmatprep.mubr.msk.f32.mxu1 %vm805_vm12, %v5524_v8  ;;  %4770 = vmatpush3.bf16.msra.mxu1 %v4767_v43  ;;  %v6674_v8 = vld [vmem:[#allocation8_spill] sm:$0xff]  ;;  %v2143_v12 = vpop.permute.xlu0 %2142 }
 0x1e5   : > { %4819 = vmatprep.subr.bf16.mxu1 %v5232_v36  ;;  %vm2173_vm3 = vcmp.eq.s32.totalorder %v2143_v12, %v6687_v55 }
 0x1e6   : > { %v3923_v43 = vsel %vm2173_vm3, 1.0, %v6689_v14  ;;  %vm3604_vm3 = vcmask 1047559  }
 0x1e7   : > { %4453 = vmatmul.mubr.msk.f32.gmra.mrb[4].mxu1 %vm805_vm12, %v5563_v38  ;;  %v6678_v38 = vld [vmem:[#allocation16_spill] sm:$0xff] }
 0x1e8   : > { %4455 = vmatprep.mubr.msk.f32.mxu1 %vm805_vm12, %v5567_v40  ;;  %v6679_v40 = vld [vmem:[#allocation17_spill] sm:$0xff]  ;;  %v2149_v24 = vpop.permute.xlu0 %2148 }
 0x1e9   : > { %vm2175_vm6 = vcmp.eq.s32.totalorder %v2149_v24, %v6687_v55 }
 0x1eb   : > { %4456 = vmatmul.mubr.msk.f32.gmra.mrb[6].mxu1 %vm805_vm12, %v5605_v1  ;;  %v6683_v1 = vld [vmem:[#allocation20_spill] sm:$0xff] }
 0x1ec   : > { %4458 = vmatprep.mubr.msk.f32.mxu1 %vm805_vm12, %v5609_v2  ;;  %v6684_v2 = vld [vmem:[#allocation21_spill] sm:$0xff] }
 0x1ef   : > { %4459 = vmatmul.mubr.msk.f32.gmra.mrb[8].mxu1 %vm805_vm12, %v5647_v34 }
 0x1f0   : > { %4461 = vmatprep.mubr.msk.f32.mxu1 %vm805_vm12, %v5651_v35  ;;  %v6686_v35 = vld [vmem:[#allocation24_spill] sm:$0xff] }
 0x1f3   : > { %4462 = vmatmul.mubr.msk.f32.gmra.mrb[10].mxu1 %vm805_vm12, %v5689_v21 }
 0x1f4   : > { %4464 = vmatprep.mubr.msk.f32.mxu1 %vm805_vm12, %v6667_v25 }
 0x1f7   : > { %4465 = vmatmul.mubr.msk.f32.gmra.mrb[12].mxu1 %vm805_vm12, %v6668_v47 }
 0x1f8   : > { %4467 = vmatprep.mubr.msk.f32.mxu1 %vm805_vm12, %v6669_v48  ;;  %v3925_v48 = vsel %vm2175_vm6, 1.0, %v6689_v14 }
 0x1fb   : > { %4468 = vmatmul.mubr.msk.f32.gmra.mrb[14].mxu1 %vm805_vm12, %v6670_v60 }
 0x1fc   : > { %4478 = vmatprep.mubr.msk.f32.mxu1 %vm805_vm12, %v6671_v61  ;;  %v2494_v61 = vld [vmem:[%s6602_s7] sm:$0xff] }
 0x1ff   : > { %4479 = vmatmul.mubr.msk.f32.vlgmr.msra.gmra.mrb[0].mxu1 %vm805_vm12, %v6672_v62  ;;  %v2495_v62 = vld [vmem:[%s6602_s7 + $0x8] sm:$0xff] }
 0x200   : > { %4823 = vmatpush3.bf16.msra.mxu1 %v5232_v36  ;;  %4481 = vmatprep.mubr.msk.f32.mxu1 %vm805_vm12, %v6673_v4  ;;  %v2104_v36 = vpop.permute.xlu1 %2103  ;;  %v4787_v4 = vpack.c.bf16 %v2495_v62, %v2494_v61 }
 0x201   : > { %4820 = vmatprep.subr.bf16.mxu1 %v6674_v8  ;;  %vm2160_vm2 = vcmp.eq.s32.totalorder %v2104_v36, %v6687_v55  ;;  %v6073_v36 = vadd.s32 8, %v5390_v5 }
 0x202   : > { %v3910_v23 = vsel %vm2160_vm2, 1.0, %v6689_v14  ;;  %4788 = vmatprep.subr.bf16.mxu0 %v4787_v4 }
 0x203   : > { %4482 = vmatmul.mubr.msk.f32.gmra.mrb[2].mxu1 %vm805_vm12, %v6675_v28  ;;  %4790 = vmatpush3.bf16.msra.mxu0 %v4787_v4  ;;  %v4003_v28 = vld [vmem:[%s6602_s7 + $0x28] sm:$0xff] }
 0x204   : > { %4484 = vmatprep.mubr.msk.f32.mxu1 %vm805_vm12, %v6676_v31  ;;  %4824 = vmatpush3.bf16.msra.mxu1 %v6674_v8  ;;  %v2110_v11 = vpop.permute.xlu1 %2109  ;;  %v4002_v8 = vld [vmem:[%s6602_s7 + $0x20] sm:$0xff] }
 0x205   : > { %4821 = vmatprep.subr.bf16.mxu1 %v6677_v33  ;;  %vm2162_vm4 = vcmp.eq.s32.totalorder %v2110_v11, %v6687_v55  ;;  %v6065_v31 = vpack.c.bf16 %v4003_v28, %v4002_v8 }
 0x207   : > { %4485 = vmatmul.mubr.msk.f32.gmra.mrb[4].mxu1 %vm805_vm12, %v6678_v38  ;;  %4792 = vmatprep.subr.bf16.mxu0 %v6065_v31  ;;  %v6629_v38 = vsub.s32 0, %v5390_v5 }
 0x208   : > { %4487 = vmatprep.mubr.msk.f32.mxu1 %vm805_vm12, %v6679_v40  ;;  %4825 = vmatpush3.bf16.msra.mxu1 %v6677_v33  ;;  %v2116_v34 = vpop.permute.xlu1 %2115 }
 0x209   : > { %4822 = vmatprep.subr.msk.mxu1 %vm2305_vm9, %v6680_v51  ;;  %vm2164_vm7 = vcmp.eq.s32.totalorder %v2116_v34, %v6687_v55 }
 0x20a   : > { %v3914_v53 = vsel %vm2164_vm7, 1.0, %v6689_v14 }
 0x20b   : > { %4488 = vmatmul.mubr.msk.f32.gmra.mrb[6].mxu1 %vm805_vm12, %v6681_v56 }
 0x20c   : > { %4490 = vmatprep.mubr.msk.f32.mxu1 %vm805_vm12, %v6682_v63  ;;  %4826 = vmatpush3.msk.msra.mxu1 %vm2305_vm9, %v6680_v51  ;;  %vm2159_vm9 = vcmp.eq.s32.totalorder %v2101_v32, %v6687_v55  ;;  %v2122_v21 = vpop.permute.xlu1 %2121  ;;  %v1973_v32 = vld [vmem:[%s6601_s6] sm:$0x1] }
 0x20d   : > { %v3909_v54 = vsel %vm2159_vm9, 1.0, %v6689_v14  ;;  %vm2166_vm1 = vcmp.eq.s32.totalorder %v2122_v21, %v6687_v55  ;;  %vm2171_vm9 = vcmp.eq.s32.totalorder %v2137_v19, %v6687_v55  ;;  %v1974_v33 = vsub.s32 16, %v1973_v32  ;;  %v6080_v51 = vld [vmem:[%s6600_s5] ss:$0 sm:$0xff] }
 0x20e   : > { %v3916_v26 = vsel %vm2166_vm1, 1.0, %v6689_v14  ;;  %v3921_v57 = vsel %vm2171_vm9, 1.0, %v6689_v14  ;;  %vm3600_vm9 = vcmask 1045509  }
 0x20f   : > { %4491 = vmatmul.mubr.msk.f32.gmra.mrb[8].mxu1 %vm805_vm12, %v6683_v1  ;;  %v1978_v40 = vrot.slane %v1974_v33, %v6629_v38 }
 0x210   : > { %4493 = vmatprep.mubr.msk.f32.mxu1 %vm805_vm12, %v6684_v2 }
 0x211   : > { %vm1979_vm8 = vcmp.le.s32.totalorder %v5390_v5, %v1978_v40 }
 0x212   : > { %v6090_v22 = vsel %vm1979_vm8, 1.0, %v6689_v14 }
 0x213   : > { %4494 = vmatmul.mubr.msk.f32.gmra.mrb[10].mxu1 %vm805_vm12, %v6685_v52 }
 0x214   : > { %4496 = vmatprep.mubr.msk.f32.mxu1 %vm805_vm12, %v6686_v35 }
 0x217   : > { %4497 = vmatmul.mubr.msk.f32.gmra.mrb[12].mxu1 %vm805_vm12, %v5770_v30  ;;  %v2128_v30 = vpop.permute.xlu1 %2127 }
 0x218   : > { %4499 = vmatprep.mubr.msk.f32.mxu1 %vm805_vm12, %v6688_v46 }
 0x21b   : > { %4500 = vmatmul.mubr.msk.f32.gmra.mrb[14].mxu1 %vm805_vm12, %v5792_v20  ;;  %v3912_v20 = vsel %vm2162_vm4, 1.0, %v6689_v14  ;;  %v2134_v3 = vpop.permute.xlu1 %2133  ;;  %vm2168_vm12 = vcmp.eq.s32.totalorder %v2128_v30, %v6687_v55 }
 0x21c   : > { %4525 = vmatprep.mubr.msk.f32.mxu1 %vm2232_vm5, %v3909_v54  ;;  %v3918_v18 = vsel %vm2168_vm12, 1.0, %v6689_v14  ;;  %vm2170_vm15 = vcmp.eq.s32.totalorder %v2134_v3, %v6687_v55  ;;  %vm3594_vm12 = vcmask 1042434  }
 0x21d   : > { %v3920_v15 = vsel %vm2170_vm15, 1.0, %v6689_v14  ;;  %vm3598_vm15 = vcmask 1044484  }
 0x21f   : > { %4526 = vmatmul.mubr.msk.f32.vlgmr.msra.gmra.mrb[16].mxu1 %vm2232_vm5, %v3910_v23  ;;  %v2140_v50 = vpop.permute.xlu1 %2139 }
 0x220   : > { %4528 = vmatprep.mubr.msk.f32.mxu1 %vm2232_vm5, %v3911_v17  ;;  %vm2172_vm2 = vcmp.eq.s32.totalorder %v2140_v50, %v6687_v55 }
 0x221   : > { %v3922_v42 = vsel %vm2172_vm2, 1.0, %v6689_v14  ;;  %vm3602_vm2 = vcmask 1046534  }
 0x223   : > { %4529 = vmatmul.mubr.msk.f32.gmra.mrb[18].mxu1 %vm2232_vm5, %v3912_v20  ;;  %v2146_v44 = vpop.permute.xlu1 %2145 }
 0x224   : > { %4531 = vmatprep.mubr.msk.f32.mxu1 %vm2232_vm5, %v3913_v59  ;;  %vm2174_vm4 = vcmp.eq.s32.totalorder %v2146_v44, %v6687_v55 }
 0x225   : > { %v3924_v47 = vsel %vm2174_vm4, 1.0, %v6689_v14 }
 0x227   : > { %4532 = vmatmul.mubr.msk.f32.gmra.mrb[20].mxu1 %vm2232_vm5, %v3914_v53  ;;  %v2152_v25 = vpop.permute.xlu1 %2151 }
 0x228   : > { %4534 = vmatprep.mubr.msk.f32.mxu1 %vm2232_vm5, %v3915_v7  ;;  %vm2176_vm7 = vcmp.eq.s32.totalorder %v2152_v25, %v6687_v55 }
 0x229   : > { %v3926_v60 = vsel %vm2176_vm7, 1.0, %v6689_v14 }
 0x22b   : > { %4535 = vmatmul.mubr.msk.f32.gmra.mrb[22].mxu1 %vm2232_vm5, %v3916_v26 }
 0x22c   : > { %4537 = vmatprep.mubr.msk.f32.mxu1 %vm2232_vm5, %v3917_v6 }
 0x22f   : > { %4538 = vmatmul.mubr.msk.f32.gmra.mrb[24].mxu1 %vm2232_vm5, %v3918_v18 }
 0x230   : > { %4540 = vmatprep.mubr.msk.f32.mxu1 %vm2232_vm5, %v3919_v39 }
 0x233   : > { %4541 = vmatmul.mubr.msk.f32.gmra.mrb[26].mxu1 %vm2232_vm5, %v3920_v15 }
 0x234   : > { %4543 = vmatprep.mubr.msk.f32.mxu1 %vm2232_vm5, %v3921_v57 }
 0x237   : > { %4544 = vmatmul.mubr.msk.f32.gmra.mrb[28].mxu1 %vm2232_vm5, %v3922_v42 }
 0x238   : > { %4546 = vmatprep.mubr.msk.f32.mxu1 %vm2232_vm5, %v3923_v43 }
 0x23b   : > { %4547 = vmatmul.mubr.msk.f32.gmra.mrb[30].mxu1 %vm2232_vm5, %v3924_v47 }
 0x23c   : > { %4549 = vmatprep.mubr.msk.f32.mxu1 %vm2232_vm5, %v3925_v48 }
 0x23f   : > { %4550 = vmatmul.mubr.msk.f32.gmra.mrb[32].mxu1 %vm2232_vm5, %v3926_v60  ;;  %vm1980_vm5 = vcmp.le.s32.totalorder %v6073_v36, %v1978_v40 }
 0x240   : > { %v6086_v11 = vsel %vm1980_vm5, 1.0, %v6689_v14 }
 0x2d2   : > { %v4480_v58 = vpop.f32.mrb[0].mxu1 }
 0x2d3   : > { %v1941_v56 = vadd.f32 %v4480_v58, %v6080_v51  ;;  %v1838_v63 = vpop.f32.mrb[1].mxu1 }
 0x2d4   : > { %v1940_v1 = vadd.f32 %v6080_v51, %v1838_v63 }
 0x2d5   : > { %v1957_v2 = vmax.f32 %v1941_v56, 0.0 }
 0x2d6   : > { %v1956_v52 = vmax.f32 %v1940_v1, 0.0  ;;  %v4483_v34 = vpop.f32.mrb[2].mxu1 }
 0x2d7   : > { %v1986_v35 = vmul.f32 %v6086_v11, %v1957_v2  ;;  %v1943_v49 = vadd.f32 %v4483_v34, %v6080_v51  ;;  %v1848_v55 = vpop.f32.mrb[3].mxu1 }
 0x2d8   : > { %v1985_v46 = vmul.f32 %v6090_v22, %v1956_v52  ;;  %v1942_v21 = vadd.f32 %v6080_v51, %v1848_v55 }
 0x2d9   : > { %v1959_v54 = vmax.f32 %v1943_v49, 0.0 }
 0x2da   : > { %v6096_v9 = vmax.f32 %v1985_v46, %v1986_v35  ;;  %v1958_v23 = vmax.f32 %v1942_v21, 0.0  ;;  %v4486_v17 = vpop.f32.mrb[4].mxu1 }
 0x2db   : > { %v1988_v30 = vmul.f32 %v6086_v11, %v1959_v54  ;;  %v1945_v20 = vadd.f32 %v4486_v17, %v6080_v51  ;;  %v1858_v59 = vpop.f32.mrb[5].mxu1 }
 0x2dc   : > { %v1987_v41 = vmul.f32 %v6090_v22, %v1958_v23  ;;  %v1944_v53 = vadd.f32 %v6080_v51, %v1858_v59 }
 0x2dd   : > { %v1961_v3 = vmax.f32 %v1945_v20, 0.0 }
 0x2de   : > { %v6102_v7 = vmax.f32 %v1987_v41, %v1988_v30  ;;  %v1960_v19 = vmax.f32 %v1944_v53, 0.0  ;;  %v4489_v26 = vpop.f32.mrb[6].mxu1 }
 0x2df   : > { %v1990_v6 = vmul.f32 %v6086_v11, %v1961_v3  ;;  %v1947_v50 = vadd.f32 %v4489_v26, %v6080_v51  ;;  %v1868_v18 = vpop.f32.mrb[7].mxu1 }
 0x2e0   : > { %v1989_v39 = vmul.f32 %v6090_v22, %v1960_v19  ;;  %v1946_v12 = vadd.f32 %v6080_v51, %v1868_v18 }
 0x2e1   : > { %v1963_v15 = vmax.f32 %v1947_v50, 0.0 }
 0x2e2   : > { %v6108_v44 = vmax.f32 %v1989_v39, %v1990_v6  ;;  %v1962_v57 = vmax.f32 %v1946_v12, 0.0  ;;  %v4492_v24 = vpop.f32.mrb[8].mxu1 }
 0x2e3   : > { %v1992_v42 = vmul.f32 %v6086_v11, %v1963_v15  ;;  %v1949_v43 = vadd.f32 %v4492_v24, %v6080_v51  ;;  %v1878_v25 = vpop.f32.mrb[9].mxu1 }
 0x2e4   : > { %v1991_v47 = vmul.f32 %v6090_v22, %v1962_v57  ;;  %v1948_v60 = vadd.f32 %v6080_v51, %v1878_v25 }
 0x2e5   : > { %v1965_v48 = vmax.f32 %v1949_v43, 0.0 }
 0x2e6   : > { %v6114_v61 = vmax.f32 %v1991_v47, %v1992_v42  ;;  %v4495_v62 = vpop.f32.mrb[10].mxu1  ;;  %v1964_v8 = vmax.f32 %v1948_v60, 0.0 }
 0x2e7   : > { %v1994_v4 = vmul.f32 %v6086_v11, %v1965_v48  ;;  %v1951_v28 = vadd.f32 %v4495_v62, %v6080_v51  ;;  %v1888_v32 = vpop.f32.mrb[11].mxu1 }
 0x2e8   : > { %v1950_v33 = vadd.f32 %v6080_v51, %v1888_v32  ;;  %v1993_v40 = vmul.f32 %v6090_v22, %v1964_v8 }
 0x2e9   : > { %v1967_v58 = vmax.f32 %v1951_v28, 0.0 }
 0x2ea   : > { %v1966_v56 = vmax.f32 %v1950_v33, 0.0  ;;  %v4498_v63 = vpop.f32.mrb[12].mxu1  ;;  %v6120_v1 = vmax.f32 %v1993_v40, %v1994_v4 }
 0x2eb   : > { %v1996_v2 = vmul.f32 %v6086_v11, %v1967_v58  ;;  %v1953_v52 = vadd.f32 %v4498_v63, %v6080_v51  ;;  %v1898_v34 = vpop.f32.mrb[13].mxu1 }
 0x2ec   : > { %v1995_v35 = vmul.f32 %v6090_v22, %v1966_v56  ;;  %v1952_v49 = vadd.f32 %v6080_v51, %v1898_v34 }
 0x2ed   : > { %v1969_v55 = vmax.f32 %v1953_v52, 0.0 }
 0x2ee   : > { %v6126_v46 = vmax.f32 %v1995_v35, %v1996_v2  ;;  %v1968_v21 = vmax.f32 %v1952_v49, 0.0  ;;  %v4501_v54 = vpop.f32.mrb[14].mxu1 }
 0x2ef   : > { %v1998_v23 = vmul.f32 %v6086_v11, %v1969_v55  ;;  %v1955_v17 = vadd.f32 %v4501_v54, %v6080_v51  ;;  %v1908_v30 = vpop.f32.mrb[15].mxu1 }
 0x2f0   : > { %v1997_v20 = vmul.f32 %v6090_v22, %v1968_v21  ;;  %v1954_v59 = vadd.f32 %v6080_v51, %v1908_v30 }
 0x2f1   : > { %v1971_v41 = vmax.f32 %v1955_v17, 0.0 }
 0x2f2   : > { %v6132_v53 = vmax.f32 %v1997_v20, %v1998_v23  ;;  %v1970_v3 = vmax.f32 %v1954_v59, 0.0  ;;  %v6134_v19 = vpop.f32.mrb[16].mxu1 }
 0x2f3   : > { %v2000_v26 = vmul.f32 %v6086_v11, %v1971_v41  ;;  %v2503_v6 = vrot.slane %v6134_v19, 1  ;;  %v6138_v50 = vpop.f32.mrb[17].mxu1  ;;  %v3069_v12 = vrot.slane %v6134_v19, 2 }
 0x2f4   : > { %6690 = vst [vmem:[#allocation22_spill] sm:$0xff] %v6132_v53  ;;  %v1999_v18 = vmul.f32 %v6090_v22, %v1970_v3  ;;  %v2502_v39 = vrot.slane %v6138_v50, 1  ;;  %v3068_v51 = vrot.slane %v6138_v50, 2 }
 0x2f6   : > { %v6144_v15 = vmax.f32 %v1999_v18, %v2000_v26  ;;  %v6146_v57 = vpop.f32.mrb[18].mxu1  ;;  %v2537_v11 = vsel %vm783_vm11, %v2501_v45, %v2502_v39  ;;  %v2536_v22 = vsel %vm783_vm11, %v2502_v39, %v2503_v6  ;;  %v6166_v45 = vsel %vm1208_vm13, %v3067_v10, %v3068_v51 }
 0x2f7   : > { %v2505_v24 = vrot.slane %v6146_v57, 1  ;;  %v6153_v42 = vpop.f32.mrb[19].mxu1  ;;  %4563 = vmatmul.mubr.msk.f32.gmra.mrb[26].mxu0 %vm2547_vm0, %v2537_v11  ;;  %v3071_v25 = vrot.slane %v6146_v57, 2  ;;  %v6170_v48 = vsel %vm1208_vm13, %v3068_v51, %v3069_v12 }
 0x2f8   : > { %6691 = vst [vmem:[#allocation27_spill] sm:$0xff] %v6144_v15  ;;  %v2504_v43 = vrot.slane %v6153_v42, 1  ;;  %4565 = vmatprep.mubr.msk.f32.mxu0 %vm2547_vm0, %v2536_v22  ;;  %v3070_v47 = vrot.slane %v6153_v42, 2  ;;  %v6692_v15 = vld [vmem:[#allocation26_spill] sm:$0xff] }
 0x2fa   : > { %v6172_v60 = vpop.f32.mrb[20].mxu1  ;;  %v2535_v62 = vsel %vm783_vm11, %v2503_v6, %v2504_v43  ;;  %v2534_v10 = vsel %vm783_vm11, %v2504_v43, %v2505_v24  ;;  %v6185_v32 = vsel %vm1208_vm13, %v3069_v12, %v3070_v47  ;;  %v6192_v58 = vsel %vm1208_vm13, %v3070_v47, %v3071_v25 }
 0x2fb   : > { %v2507_v4 = vrot.slane %v6172_v60, 1  ;;  %v3073_v8 = vrot.slane %v6172_v60, 2  ;;  %v6178_v28 = vpop.f32.mrb[21].mxu1  ;;  %4566 = vmatmul.mubr.msk.f32.gmra.mrb[28].mxu0 %vm2547_vm0, %v2535_v62 }
 0x2fc   : > { %v2506_v33 = vrot.slane %v6178_v28, 1  ;;  %v3072_v40 = vrot.slane %v6178_v28, 2  ;;  %4568 = vmatprep.mubr.msk.f32.mxu0 %vm2547_vm0, %v2534_v10 }
 0x2fe   : > { %v6194_v56 = vpop.f32.mrb[22].mxu1  ;;  %v2533_v63 = vsel %vm783_vm11, %v2505_v24, %v2506_v33  ;;  %v2532_v2 = vsel %vm783_vm11, %v2506_v33, %v2507_v4  ;;  %v6207_v49 = vsel %vm1208_vm13, %v3071_v25, %v3072_v40  ;;  %v6211_v55 = vsel %vm1208_vm13, %v3072_v40, %v3073_v8 }
 0x2ff   : > { %v2509_v52 = vrot.slane %v6194_v56, 1  ;;  %v3075_v34 = vrot.slane %v6194_v56, 2  ;;  %v6202_v35 = vpop.f32.mrb[23].mxu1  ;;  %4569 = vmatmul.mubr.msk.f32.gmra.mrb[30].mxu0 %vm2547_vm0, %v2533_v63 }
 0x300   : > { %v2508_v21 = vrot.slane %v6202_v35, 1  ;;  %v3074_v54 = vrot.slane %v6202_v35, 2  ;;  %4571 = vmatprep.mubr.msk.f32.mxu0 %vm2547_vm0, %v2532_v2 }
 0x302   : > { %v6216_v23 = vpop.f32.mrb[24].mxu1  ;;  %v2531_v17 = vsel %vm783_vm11, %v2507_v4, %v2508_v21  ;;  %v2530_v30 = vsel %vm783_vm11, %v2508_v21, %v2509_v52  ;;  %v6224_v20 = vsel %vm1208_vm13, %v3073_v8, %v3074_v54  ;;  %v6233_v26 = vsel %vm1208_vm13, %v3074_v54, %v3075_v34 }
 0x303   : > { %v2511_v59 = vrot.slane %v6216_v23, 1  ;;  %v3077_v41 = vrot.slane %v6216_v23, 2  ;;  %v6228_v3 = vpop.f32.mrb[25].mxu1  ;;  %4572 = vmatmul.mubr.msk.f32.gmra.mrb[32].mxu0 %vm2547_vm0, %v2531_v17 }
 0x304   : > { %v2510_v6 = vrot.slane %v6228_v3, 1  ;;  %v3076_v18 = vrot.slane %v6228_v3, 2  ;;  %4574 = vmatprep.mubr.msk.f32.mxu0 %vm2547_vm0, %v2530_v30 }
 0x306   : > { %v6238_v39 = vpop.f32.mrb[26].mxu1  ;;  %v2529_v12 = vsel %vm783_vm11, %v2509_v52, %v2510_v6  ;;  %v2528_v51 = vsel %vm783_vm11, %v2510_v6, %v2511_v59  ;;  %v6246_v11 = vsel %vm1208_vm13, %v3075_v34, %v3076_v18  ;;  %v6250_v24 = vsel %vm1208_vm13, %v3076_v18, %v3077_v41 }
 0x307   : > { %v2513_v22 = vrot.slane %v6238_v39, 1  ;;  %v3079_v43 = vrot.slane %v6238_v39, 2  ;;  %v6254_v25 = vpop.f32.mrb[27].mxu1  ;;  %4575 = vmatmul.mubr.msk.f32.gmra.mrb[34].mxu0 %vm2547_vm0, %v2529_v12 }
 0x308   : > { %v2512_v47 = vrot.slane %v6254_v25, 1  ;;  %v3078_v62 = vrot.slane %v6254_v25, 2  ;;  %4577 = vmatprep.mubr.msk.f32.mxu0 %vm2547_vm0, %v2528_v51 }
 0x30a   : > { %v6260_v4 = vpop.f32.mrb[28].mxu1  ;;  %v2527_v8 = vsel %vm783_vm11, %v2511_v59, %v2512_v47  ;;  %v2526_v10 = vsel %vm783_vm11, %v2512_v47, %v2513_v22  ;;  %v6268_v33 = vsel %vm1208_vm13, %v3077_v41, %v3078_v62  ;;  %v6272_v40 = vsel %vm1208_vm13, %v3078_v62, %v3079_v43 }
 0x30b   : > { %v2515_v63 = vrot.slane %v6260_v4, 1  ;;  %v3081_v2 = vrot.slane %v6260_v4, 2  ;;  %v2465_v52 = vpop.f32.mrb[29].mxu1  ;;  %4578 = vmatmul.mubr.msk.f32.gmra.mrb[36].mxu0 %vm2547_vm0, %v2527_v8 }
 0x30c   : > { %v2514_v34 = vrot.slane %v2465_v52, 1  ;;  %v3080_v21 = vrot.slane %v2465_v52, 2  ;;  %4580 = vmatprep.mubr.msk.f32.mxu0 %vm2547_vm0, %v2526_v10 }
 0x30e   : > { %v4548_v54 = vpop.f32.mrb[30].mxu1  ;;  %v2525_v17 = vsel %vm783_vm11, %v2513_v22, %v2514_v34  ;;  %v2524_v30 = vsel %vm783_vm11, %v2514_v34, %v2515_v63  ;;  %v6284_v59 = vsel %vm1208_vm13, %v3079_v43, %v3080_v21  ;;  %v6288_v41 = vsel %vm1208_vm13, %v3080_v21, %v3081_v2 }
 0x30f   : > { %v2517_v6 = vrot.slane %v4548_v54, 1  ;;  %v3083_v18 = vrot.slane %v4548_v54, 2  ;;  %v2475_v12 = vpop.f32.mrb[31].mxu1  ;;  %4581 = vmatmul.mubr.msk.f32.gmra.mrb[38].mxu0 %vm2547_vm0, %v2525_v17 }
 0x310   : > { %v2516_v51 = vrot.slane %v2475_v12, 1  ;;  %v3082_v47 = vrot.slane %v2475_v12, 2  ;;  %4583 = vmatprep.mubr.msk.f32.mxu0 %vm2547_vm0, %v2524_v30 }
 0x312   : > { %v4551_v22 = vpop.f32.mrb[32].mxu1  ;;  %v2523_v62 = vsel %vm783_vm11, %v2515_v63, %v2516_v51  ;;  %v2522_v43 = vsel %vm783_vm11, %v2516_v51, %v2517_v6  ;;  %v3089_v8 = vsel %vm1208_vm13, %v3081_v2, %v3082_v47  ;;  %v3088_v10 = vsel %vm1208_vm13, %v3082_v47, %v3083_v18 }
 0x313   : > { %v2519_v34 = vrot.slane %v4551_v22, 1  ;;  %v3085_v21 = vrot.slane %v4551_v22, 2  ;;  %v2485_v17 = vpop.f32.mrb[33].mxu1  ;;  %4584 = vmatmul.mubr.msk.f32.gmra.mrb[40].mxu0 %vm2547_vm0, %v2523_v62  ;;  %v6693_v63 = vrot.slane %v6692_v15, 2 }
 0x314   : > { %v2518_v38 = vrot.slane %v2485_v17, 1  ;;  %v3084_v30 = vrot.slane %v2485_v17, 2  ;;  %4586 = vmatprep.mubr.msk.f32.mxu0 %vm2547_vm0, %v2522_v43  ;;  %v6694_v43 = vrot.slane %v6692_v15, 1 }
 0x315   : > { %v3109_v51 = vsel %vm1208_vm13, %v3085_v21, %v6693_v63 }
 0x316   : > { %v2521_v2 = vsel %vm783_vm11, %v2517_v6, %v2518_v38  ;;  %v2520_v47 = vsel %vm783_vm11, %v2518_v38, %v2519_v34  ;;  %v3087_v53 = vsel %vm1208_vm13, %v3083_v18, %v3084_v30  ;;  %v3086_v62 = vsel %vm1208_vm13, %v3084_v30, %v3085_v21  ;;  %v6695_v38 = vld [vmem:[#allocation25_spill] sm:$0xff]  ;;  %v6696_v6 = vld [vmem:[#allocation30_spill] sm:$0xff] }
 0x317   : > { %4587 = vmatmul.mubr.msk.f32.gmra.mrb[42].mxu0 %vm2547_vm0, %v2521_v2  ;;  %v2543_v63 = vsel %vm783_vm11, %v2519_v34, %v6694_v43  ;;  %vm5051_vm11 = vmmov 0   ;;  %v2002_v18 = vrot.slane %v6096_v9, 4 }
 0x318   : > { %4589 = vmatprep.mubr.msk.f32.mxu0 %vm2547_vm0, %v2520_v47  ;;  %4704 = vmatprep.mubr.msk.f32.mxu1 %vm5051_vm11, %v6689_v14 }
 0x319   : > { %v2003_v2 = vmax.f32 %v6096_v9, %v2002_v18 }
 0x31b   : > { %4590 = vmatmul.mubr.msk.f32.gmra.mrb[44].mxu0 %vm2547_vm0, %v2543_v63 }
 0x31c   : > { %4596 = vmatprep.mubr.msk.f32.mxu0 %vm2547_vm0, %v6692_v15  ;;  %v3566_v15 = vld [vmem:[%s6605_s10 + $0x28] sm:$0xff] }
 0x31f   : > { %4597 = vmatmul.mubr.msk.f32.vlgmr.msra.gmra.mrb[22].mxu0 %vm2547_vm0, %v6695_v38 }
 0x320   : > { %4794 = vmatpush3.bf16.msra.mxu0 %v6065_v31  ;;  %4599 = vmatprep.mubr.msk.f32.mxu0 %vm2547_vm0, %v5781_v0  ;;  %v6697_v0 = vld [vmem:[#allocation31_spill] sm:$0xff] }
 0x321   : > { %v3563_v31 = vld [vmem:[%s6605_s10 + $0x10] sm:$0xff] }
 0x323   : > { %4600 = vmatmul.mubr.msk.f32.gmra.mrb[24].mxu0 %vm2547_vm0, %v6696_v6 }
 0x324   : > { %4602 = vmatprep.mubr.msk.f32.mxu0 %vm2547_vm0, %v5822_v29  ;;  %v3562_v29 = vld [vmem:[%s6605_s10 + $0x8] sm:$0xff] }
 0x327   : > { %4603 = vmatmul.mubr.msk.f32.gmra.mrb[26].mxu0 %vm2547_vm0, %v5804_v13  ;;  %v6698_v13 = vld [vmem:[#allocation33_spill] sm:$0xff] }
 0x328   : > { %4605 = vmatprep.mubr.msk.f32.mxu0 %vm2547_vm0, %v6138_v50  ;;  %v3565_v50 = vld [vmem:[%s6605_s10 + $0x20] sm:$0xff] }
 0x32b   : > { %4606 = vmatmul.mubr.msk.f32.gmra.mrb[28].mxu0 %vm2547_vm0, %v6134_v19 }
 0x32c   : > { %4608 = vmatprep.mubr.msk.f32.mxu0 %vm2547_vm0, %v6153_v42  ;;  %v3567_v42 = vld [vmem:[%s6605_s10 + $0x30] sm:$0xff] }
 0x32f   : > { %4609 = vmatmul.mubr.msk.f32.gmra.mrb[30].mxu0 %vm2547_vm0, %v6146_v57  ;;  %v4802_v57 = vpack.c.bf16 %v3566_v15, %v3565_v50 }
 0x330   : > { %4611 = vmatprep.mubr.msk.f32.mxu0 %vm2547_vm0, %v6178_v28  ;;  %v3570_v28 = vld [vmem:[%s6605_s10 + $0x48] sm:$0xff] }
 0x333   : > { %4612 = vmatmul.mubr.msk.f32.gmra.mrb[32].mxu0 %vm2547_vm0, %v6172_v60  ;;  %v3569_v60 = vld [vmem:[%s6605_s10 + $0x40] sm:$0xff] }
 0x334   : > { %4614 = vmatprep.mubr.msk.f32.mxu0 %vm2547_vm0, %v6202_v35 }
 0x337   : > { %4615 = vmatmul.mubr.msk.f32.gmra.mrb[34].mxu0 %vm2547_vm0, %v6194_v56  ;;  %v3572_v56 = vld [vmem:[%s6605_s10 + $0x58] sm:$0xff] }
 0x338   : > { %4617 = vmatprep.mubr.msk.f32.mxu0 %vm2547_vm0, %v6228_v3  ;;  %v3576_v3 = vld [vmem:[%s6605_s10 + $0x78] sm:$0xff] }
 0x33b   : > { %4618 = vmatmul.mubr.msk.f32.gmra.mrb[36].mxu0 %vm2547_vm0, %v6216_v23 }
 0x33c   : > { %4620 = vmatprep.mubr.msk.f32.mxu0 %vm2547_vm0, %v6254_v25 }
 0x33f   : > { %4621 = vmatmul.mubr.msk.f32.gmra.mrb[38].mxu0 %vm2547_vm0, %v6238_v39  ;;  %v3450_v39 = vld [vmem:[%s6604_s9] sm:$0x1] }
 0x340   : > { %4623 = vmatprep.mubr.msk.f32.mxu0 %vm2547_vm0, %v2465_v52 }
 0x343   : > { %4624 = vmatmul.mubr.msk.f32.gmra.mrb[40].mxu0 %vm2547_vm0, %v6260_v4  ;;  %v6465_v4 = vld [vmem:[%s6603_s8] ss:$0 sm:$0xff] }
 0x344   : > { %4626 = vmatprep.mubr.msk.f32.mxu0 %vm2547_vm0, %v2475_v12 }
 0x347   : > { %4627 = vmatmul.mubr.msk.f32.gmra.mrb[42].mxu0 %vm2547_vm0, %v4548_v54 }
 0x348   : > { %4629 = vmatprep.mubr.msk.f32.mxu0 %vm2547_vm0, %v2485_v17 }
 0x34b   : > { %4630 = vmatmul.mubr.msk.f32.gmra.mrb[44].mxu0 %vm2547_vm0, %v4551_v22 }
 0x34c   : > { %4636 = vmatprep.mubr.msk.f32.mxu0 %vm2547_vm0, %v6697_v0 }
 0x34f   : > { %4637 = vmatmul.mubr.msk.f32.vlgmr.msra.gmra.mrb[22].mxu0 %vm2547_vm0, %v6698_v13 }
 0x350   : > { %4639 = vmatprep.mubr.msk.f32.mxu0 %vm2547_vm0, %v5816_v16  ;;  %v3561_v16 = vld [vmem:[%s6605_s10] sm:$0xff] }
 0x353   : > { %4640 = vmatmul.mubr.msk.f32.gmra.mrb[24].mxu0 %vm2547_vm0, %v5839_v37  ;;  %v4796_v37 = vpack.c.bf16 %v3562_v29, %v3561_v16 }
 0x354   : > { %4642 = vmatprep.mubr.msk.f32.mxu0 %vm2547_vm0, %v5845_v27  ;;  %v5050_v27 = vmov 0.0|0.0  }
 0x355   : > { %4795 = vmatprep.subr.bf16.mxu1 %v5050_v27 }
 0x356   : > { %4797 = vmatpush3.bf16.msra.mxu1 %v4796_v37 }
 0x357   : > { %4643 = vmatmul.mubr.msk.f32.gmra.mrb[26].mxu0 %vm2547_vm0, %v6166_v45  ;;  %4798 = vmatprep.subr.bf16.mxu1 %v5050_v27  ;;  %v3568_v45 = vld [vmem:[%s6605_s10 + $0x38] sm:$0xff] }
 0x358   : > { %4645 = vmatprep.mubr.msk.f32.mxu0 %vm2547_vm0, %v6170_v48  ;;  %v4805_v48 = vpack.c.bf16 %v3568_v45, %v3567_v42 }
 0x35b   : > { %4646 = vmatmul.mubr.msk.f32.gmra.mrb[28].mxu0 %vm2547_vm0, %v6185_v32  ;;  %v4808_v32 = vpack.c.bf16 %v3570_v28, %v3569_v60  ;;  %v2023_v60 = vrot.slane %v6114_v61, 4 }
 0x35c   : > { %4648 = vmatprep.mubr.msk.f32.mxu0 %vm2547_vm0, %v6192_v58  ;;  %v3571_v58 = vld [vmem:[%s6605_s10 + $0x50] sm:$0xff] }
 0x35d   : > { %v4811_v35 = vpack.c.bf16 %v3572_v56, %v3571_v58 }
 0x35f   : > { %4649 = vmatmul.mubr.msk.f32.gmra.mrb[30].mxu0 %vm2547_vm0, %v6207_v49  ;;  %v3573_v49 = vld [vmem:[%s6605_s10 + $0x60] sm:$0xff] }
 0x360   : > { %4651 = vmatprep.mubr.msk.f32.mxu0 %vm2547_vm0, %v6211_v55  ;;  %v3574_v55 = vld [vmem:[%s6605_s10 + $0x68] sm:$0xff] }
 0x361   : > { %v4814_v23 = vpack.c.bf16 %v3574_v55, %v3573_v49 }
 0x363   : > { %4652 = vmatmul.mubr.msk.f32.gmra.mrb[32].mxu0 %vm2547_vm0, %v6224_v20  ;;  %v3575_v20 = vld [vmem:[%s6605_s10 + $0x70] sm:$0xff] }
 0x364   : > { %4654 = vmatprep.mubr.msk.f32.mxu0 %vm2547_vm0, %v6233_v26  ;;  %v4817_v26 = vpack.c.bf16 %v3576_v3, %v3575_v20 }
 0x367   : > { %4655 = vmatmul.mubr.msk.f32.gmra.mrb[34].mxu0 %vm2547_vm0, %v6246_v11  ;;  %v3451_v11 = vsub.s32 24, %v3450_v39 }
 0x368   : > { %4657 = vmatprep.mubr.msk.f32.mxu0 %vm2547_vm0, %v6250_v24  ;;  %v6699_v24 = vsub.s32 0, %v5390_v5 }
 0x36a   : > { %v3455_v25 = vrot.slane %v3451_v11, %v6699_v24 }
 0x36b   : > { %4658 = vmatmul.mubr.msk.f32.gmra.mrb[36].mxu0 %vm2547_vm0, %v6268_v33 }
 0x36c   : > { %4660 = vmatprep.mubr.msk.f32.mxu0 %vm2547_vm0, %v6272_v40  ;;  %vm3457_vm13 = vcmp.le.s32.totalorder %v6073_v36, %v3455_v25  ;;  %v3449_v40 = vadd.s32 16, %v5390_v5 }
 0x36e   : > { %vm3458_vm1 = vcmp.le.s32.totalorder %v3449_v40, %v3455_v25  ;;  %v2024_v40 = vmax.f32 %v6114_v61, %v2023_v60  ;;  %v2030_v61 = vrot.slane %v6120_v1, 4 }
 0x36f   : > { %4661 = vmatmul.mubr.msk.f32.gmra.mrb[38].mxu0 %vm2547_vm0, %v6284_v59  ;;  %v6472_v59 = vsel %vm3457_vm13, 1.0, %v6689_v14  ;;  %v6487_v47 = vsel %vm3458_vm1, 1.0, %v6689_v14 }
 0x370   : > { %4663 = vmatprep.mubr.msk.f32.mxu0 %vm2547_vm0, %v6288_v41 }
 0x373   : > { %4664 = vmatmul.mubr.msk.f32.gmra.mrb[40].mxu0 %vm2547_vm0, %v3089_v8 }
 0x374   : > { %4666 = vmatprep.mubr.msk.f32.mxu0 %vm2547_vm0, %v3088_v10  ;;  %v2009_v10 = vrot.slane %v6102_v7, 4 }
 0x376   : > { %v2010_v38 = vmax.f32 %v6102_v7, %v2009_v10 }
 0x377   : > { %4667 = vmatmul.mubr.msk.f32.gmra.mrb[42].mxu0 %vm2547_vm0, %v3087_v53  ;;  %v3564_v53 = vld [vmem:[%s6605_s10 + $0x18] sm:$0xff] }
 0x378   : > { %4669 = vmatprep.mubr.msk.f32.mxu0 %vm2547_vm0, %v3086_v62  ;;  %v4799_v19 = vpack.c.bf16 %v3564_v53, %v3563_v31 }
 0x37a   : > { %4800 = vmatpush3.bf16.msra.mxu1 %v4799_v19  ;;  %v2011_v19 = vrot.slane %v2010_v38, 2 }
 0x37b   : > { %4670 = vmatmul.mubr.msk.f32.gmra.mrb[44].mxu0 %vm2547_vm0, %v3109_v51  ;;  %4801 = vmatprep.subr.bf16.mxu1 %v5050_v27  ;;  %vm3456_vm0 = vcmp.le.s32.totalorder %v5390_v5, %v3455_v25  ;;  %v2016_v5 = vrot.slane %v6108_v44, 4 }
 0x37c   : > { %v6477_v22 = vsel %vm3456_vm0, 1.0, %v6689_v14  ;;  %v2012_v55 = vmax.f32 %v2010_v38, %v2011_v19 }
 0x37d   : > { %v2017_v6 = vmax.f32 %v6108_v44, %v2016_v5 }
 0x37e   : > { %4803 = vmatpush3.bf16.msra.mxu1 %v4802_v57 }
 0x37f   : > { %4804 = vmatprep.subr.bf16.mxu1 %v5050_v27  ;;  %v2018_v50 = vrot.slane %v2017_v6, 2 }
 0x382   : > { %4806 = vmatpush3.bf16.msra.mxu1 %v4805_v48 }
 0x383   : > { %4807 = vmatprep.subr.bf16.mxu1 %v5050_v27 }
 0x386   : > { %4809 = vmatpush3.bf16.msra.mxu1 %v4808_v32 }
 0x387   : > { %4810 = vmatprep.subr.bf16.mxu1 %v5050_v27 }
 0x38a   : > { %4812 = vmatpush3.bf16.msra.mxu1 %v4811_v35 }
 0x38b   : > { %4813 = vmatprep.subr.bf16.mxu1 %v5050_v27 }
 0x38e   : > { %4815 = vmatpush3.bf16.msra.mxu1 %v4814_v23  ;;  %v2019_v23 = vmax.f32 %v2017_v6, %v2018_v50 }
 0x38f   : > { %4816 = vmatprep.subr.bf16.mxu1 %v5050_v27  ;;  %v2004_v27 = vrot.slane %v2003_v2, 2 }
 0x391   : > { %v2005_v48 = vmax.f32 %v2003_v2, %v2004_v27 }
 0x392   : > { %4818 = vmatpush3.bf16.msra.mxu1 %v4817_v26 }
 0x422   : > { %v4638_v33 = vpop.f32.mrb[22].mxu0 }
 0x423   : > { %v3402_v52 = vadd.f32 %v4638_v33, %v6465_v4  ;;  %v3251_v54 = vpop.f32.mrb[23].mxu0  ;;  %v2006_v33 = vrot.slane %v2005_v48, 1 }
 0x424   : > { %v3401_v41 = vadd.f32 %v6465_v4, %v3251_v54 }
 0x425   : > { %v3426_v12 = vmax.f32 %v3402_v52, 0.0  ;;  %v2007_v2 = vmax.f32 %v2005_v48, %v2006_v33 }
 0x426   : > { %v3425_v36 = vmax.f32 %v3401_v41, 0.0  ;;  %v4641_v8 = vpop.f32.mrb[24].mxu0 }
 0x427   : > { %v3466_v34 = vmul.f32 %v6472_v59, %v3426_v12  ;;  %v3261_v21 = vpop.f32.mrb[25].mxu0  ;;  %v3404_v30 = vadd.f32 %v4641_v8, %v6465_v4  ;;  %v2020_v8 = vrot.slane %v2019_v23, 1 }
 0x428   : > { %v3465_v17 = vmul.f32 %v6477_v22, %v3425_v36  ;;  %v3403_v51 = vadd.f32 %v6465_v4, %v3261_v21  ;;  %v2013_v36 = vrot.slane %v2012_v55, 1 }
 0x429   : > { %v3428_v16 = vmax.f32 %v3404_v30, 0.0 }
 0x42a   : > { %v3489_v62 = vmax.f32 %v3465_v17, %v3466_v34  ;;  %v3427_v43 = vmax.f32 %v3403_v51, 0.0  ;;  %v4644_v63 = vpop.f32.mrb[26].mxu0 }
 0x42b   : > { %v3406_v0 = vadd.f32 %v4644_v63, %v6465_v4  ;;  %v3271_v13 = vpop.f32.mrb[27].mxu0  ;;  %v3468_v44 = vmul.f32 %v6477_v22, %v3428_v16  ;;  %v2014_v16 = vmax.f32 %v2012_v55, %v2013_v36 }
 0x42c   : > { %v3467_v29 = vmul.f32 %v6487_v47, %v3427_v43  ;;  %v3405_v37 = vadd.f32 %v6465_v4, %v3271_v13 }
 0x42d   : > { %v3430_v31 = vmax.f32 %v3406_v0, 0.0 }
 0x42e   : > { %v3490_v9 = vmax.f32 %v3489_v62, %v3467_v29  ;;  %v3429_v14 = vmax.f32 %v3405_v37, 0.0  ;;  %v4647_v53 = vpop.f32.mrb[28].mxu0  ;;  %v2025_v62 = vrot.slane %v2024_v40, 2  ;;  %v2021_v29 = vmax.f32 %v2019_v23, %v2020_v8 }
 0x42f   : > { %v3408_v15 = vadd.f32 %v4647_v53, %v6465_v4  ;;  %v3281_v7 = vpop.f32.mrb[29].mxu0  ;;  %v3470_v58 = vmul.f32 %v6487_v47, %v3430_v31 }
 0x430   : > { %v3491_v57 = vrot.slane %v3490_v9, 4  ;;  %v3469_v42 = vmul.f32 %v6472_v59, %v3429_v14  ;;  %v3407_v45 = vadd.f32 %v6465_v4, %v3281_v7  ;;  %v2026_v50 = vmax.f32 %v2024_v40, %v2025_v62 }
 0x431   : > { %v3432_v28 = vmax.f32 %v3408_v15, 0.0  ;;  %v2031_v15 = vmax.f32 %v6120_v1, %v2030_v61 }
 0x432   : > { %v3492_v32 = vmax.f32 %v3490_v9, %v3491_v57  ;;  %v3497_v56 = vmax.f32 %v3468_v44, %v3469_v42  ;;  %v3431_v35 = vmax.f32 %v3407_v45, 0.0  ;;  %v4650_v49 = vpop.f32.mrb[30].mxu0 }
 0x433   : > { %v3472_v20 = vmul.f32 %v6472_v59, %v3432_v28  ;;  %v3410_v3 = vadd.f32 %v4650_v49, %v6465_v4  ;;  %v3291_v26 = vpop.f32.mrb[31].mxu0  ;;  %v2037_v28 = vrot.slane %v6126_v46, 4 }
 0x434   : > { %v3493_v39 = vrot.slane %v3492_v32, 2  ;;  %v3498_v11 = vmax.f32 %v3497_v56, %v3470_v58  ;;  %v3471_v24 = vmul.f32 %v6477_v22, %v3431_v35  ;;  %v3409_v25 = vadd.f32 %v6465_v4, %v3291_v26 }
 0x435   : > { %v3434_v10 = vmax.f32 %v3410_v3, 0.0  ;;  %v2032_v3 = vrot.slane %v2031_v15, 2  ;;  %v2038_v40 = vmax.f32 %v6126_v46, %v2037_v28 }
 0x436   : > { %v3494_v52 = vmax.f32 %v3492_v32, %v3493_v39  ;;  %v3499_v54 = vrot.slane %v3498_v11, 4  ;;  %v3505_v41 = vmax.f32 %v3471_v24, %v3472_v20  ;;  %v3433_v18 = vmax.f32 %v3409_v25, 0.0  ;;  %v4653_v12 = vpop.f32.mrb[32].mxu0 }
 0x437   : > { %v3412_v5 = vadd.f32 %v4653_v12, %v6465_v4  ;;  %v3301_v34 = vpop.f32.mrb[33].mxu0  ;;  %v3474_v37 = vmul.f32 %v6477_v22, %v3434_v10  ;;  %v2027_v20 = vrot.slane %v2026_v50, 1  ;;  %v2039_v61 = vrot.slane %v2038_v40, 2 }
 0x438   : > { %v3495_v21 = vrot.slane %v3494_v52, 1  ;;  %v3500_v17 = vmax.f32 %v3498_v11, %v3499_v54  ;;  %v3473_v30 = vmul.f32 %v6487_v47, %v3433_v18  ;;  %v3411_v51 = vadd.f32 %v6465_v4, %v3301_v34 }
 0x439   : > { %v3436_v43 = vmax.f32 %v3412_v5, 0.0  ;;  %v2028_v5 = vmax.f32 %v2026_v50, %v2027_v20  ;;  %v2033_v34 = vmax.f32 %v2031_v15, %v2032_v3  ;;  %v6701_v3 = vld [vmem:[#allocation27_spill] sm:$0xff] }
 0x43a   : > { %v3496_v63 = vmax.f32 %v3494_v52, %v3495_v21  ;;  %v3501_v38 = vrot.slane %v3500_v17, 2  ;;  %v3506_v6 = vmax.f32 %v3505_v41, %v3473_v30  ;;  %v3435_v0 = vmax.f32 %v3411_v51, 0.0  ;;  %v4656_v13 = vpop.f32.mrb[34].mxu0 }
 0x43b   : > { %v3414_v27 = vadd.f32 %v4656_v13, %v6465_v4  ;;  %v3311_v9 = vpop.f32.mrb[35].mxu0  ;;  %v3476_v45 = vmul.f32 %v6487_v47, %v3436_v43 }
 0x43c   : > { %v3553_v31 = vadd.f32 %v3496_v63, %v2007_v2  ;;  %v3502_v14 = vmax.f32 %v3500_v17, %v3501_v38  ;;  %v3507_v53 = vrot.slane %v3506_v6, 4  ;;  %v3475_v19 = vmul.f32 %v6472_v59, %v3435_v0 }
 0x43d   : > { %v3438_v7 = vmax.f32 %v3414_v27, 0.0  ;;  %v3413_v44 = vadd.f32 %v6465_v4, %v3311_v9 }
 0x43e   : > { %v3503_v57 = vrot.slane %v3502_v14, 1  ;;  %v3508_v42 = vmax.f32 %v3506_v6, %v3507_v53  ;;  %v3513_v48 = vmax.f32 %v3474_v37, %v3475_v19  ;;  %v4659_v60 = vpop.f32.mrb[36].mxu0  ;;  %v6700_v37 = vld [vmem:[#allocation22_spill] sm:$0xff] }
 0x43f   : > { %v3478_v32 = vmul.f32 %v6472_v59, %v3438_v7  ;;  %v3437_v58 = vmax.f32 %v3413_v44, 0.0  ;;  %v3416_v56 = vadd.f32 %v4659_v60, %v6465_v4  ;;  %v3321_v35 = vpop.f32.mrb[37].mxu0  ;;  %v2044_v27 = vrot.slane %v6700_v37, 4 }
 0x440   : > { %v3504_v49 = vmax.f32 %v3502_v14, %v3503_v57  ;;  %v3509_v55 = vrot.slane %v3508_v42, 2  ;;  %v3514_v1 = vmax.f32 %v3513_v48, %v3476_v45  ;;  %v3415_v23 = vadd.f32 %v6465_v4, %v3321_v35 }
 0x441   : > { %v3477_v26 = vmul.f32 %v6477_v22, %v3437_v58  ;;  %v3440_v54 = vmax.f32 %v3416_v56, 0.0  ;;  %v2034_v44 = vrot.slane %v2033_v34, 1  ;;  %v2040_v58 = vmax.f32 %v2038_v40, %v2039_v61 }
 0x442   : > { %v3554_v39 = vadd.f32 %v3504_v49, %v2014_v16  ;;  %v3510_v11 = vmax.f32 %v3508_v42, %v3509_v55  ;;  %v3515_v24 = vrot.slane %v3514_v1, 4  ;;  %v3439_v25 = vmax.f32 %v3415_v23, 0.0  ;;  %v4662_v33 = vpop.f32.mrb[38].mxu0 }
 0x443   : > { %v3521_v52 = vmax.f32 %v3477_v26, %v3478_v32  ;;  %v3418_v41 = vadd.f32 %v4662_v33, %v6465_v4  ;;  %v3331_v18 = vpop.f32.mrb[39].mxu0  ;;  %v3480_v43 = vmul.f32 %v6477_v22, %v3440_v54  ;;  %v2045_v56 = vmax.f32 %v6700_v37, %v2044_v27 }
 0x444   : > { %v3511_v12 = vrot.slane %v3510_v11, 1  ;;  %v3516_v36 = vmax.f32 %v3514_v1, %v3515_v24  ;;  %v3479_v8 = vmul.f32 %v6487_v47, %v3439_v25  ;;  %v3417_v10 = vadd.f32 %v6465_v4, %v3331_v18 }
 0x445   : > { %v3442_v21 = vmax.f32 %v3418_v41, 0.0  ;;  %v3593_v17 = vsel %vm3592_vm10, %v3554_v39, %v3553_v31  ;;  %v2051_v26 = vrot.slane %v6701_v3, 4  ;;  %v2035_v41 = vmax.f32 %v2033_v34, %v2034_v44 }
 0x446   : > { %v3512_v30 = vmax.f32 %v3510_v11, %v3511_v12  ;;  %v3517_v51 = vrot.slane %v3516_v36, 2  ;;  %v3522_v2 = vmax.f32 %v3521_v52, %v3479_v8  ;;  %v3441_v46 = vmax.f32 %v3417_v10, 0.0  ;;  %v4665_v62 = vpop.f32.mrb[40].mxu0 }
 0x447   : > { %v3420_v63 = vadd.f32 %v4665_v62, %v6465_v4  ;;  %v3341_v38 = vpop.f32.mrb[41].mxu0  ;;  %v3482_v9 = vmul.f32 %v6487_v47, %v3442_v21  ;;  %v2046_v18 = vrot.slane %v2045_v56, 2 }
 0x448   : > { %v3555_v6 = vadd.f32 %v3512_v30, %v2021_v29  ;;  %v3518_v0 = vmax.f32 %v3516_v36, %v3517_v51  ;;  %v3523_v13 = vrot.slane %v3522_v2, 4  ;;  %v3481_v16 = vmul.f32 %v6472_v59, %v3441_v46 }
 0x449   : > { %v3444_v31 = vmax.f32 %v3420_v63, 0.0  ;;  %v3419_v14 = vadd.f32 %v6465_v4, %v3341_v38  ;;  %v2052_v30 = vmax.f32 %v6701_v3, %v2051_v26  ;;  %v2047_v34 = vmax.f32 %v2045_v56, %v2046_v18 }
 0x44a   : > { %v3519_v53 = vrot.slane %v3518_v0, 1  ;;  %v3524_v19 = vmax.f32 %v3522_v2, %v3523_v13  ;;  %v3529_v50 = vmax.f32 %v3480_v43, %v3481_v16  ;;  %v4668_v15 = vpop.f32.mrb[42].mxu0  ;;  %v3595_v7 = vsel %vm3594_vm12, %v3555_v6, %v3593_v17 }
 0x44b   : > { %v3484_v57 = vmul.f32 %v6472_v59, %v3444_v31  ;;  %v3443_v29 = vmax.f32 %v3419_v14, 0.0  ;;  %v3422_v42 = vadd.f32 %v4668_v15, %v6465_v4  ;;  %v3351_v45 = vpop.f32.mrb[43].mxu0  ;;  %v2041_v17 = vrot.slane %v2040_v58, 1 }
 0x44c   : > { %v3520_v48 = vmax.f32 %v3518_v0, %v3519_v53  ;;  %v3525_v60 = vrot.slane %v3524_v19, 2  ;;  %v3530_v28 = vmax.f32 %v3529_v50, %v3482_v9  ;;  %v3421_v32 = vadd.f32 %v6465_v4, %v3351_v45 }
 0x44d   : > { %v3483_v35 = vmul.f32 %v6477_v22, %v3443_v29  ;;  %v3446_v11 = vmax.f32 %v3422_v42, 0.0  ;;  %v2042_v0 = vmax.f32 %v2040_v58, %v2041_v17  ;;  %v2053_v13 = vrot.slane %v2052_v30, 2  ;;  %v4032_v58 = vld [vmem:[%s6606_s11] ss:$0 sm:$0xff] }
 0x44e   : > { %v3556_v49 = vadd.f32 %v3520_v48, %v2028_v5  ;;  %v3526_v55 = vmax.f32 %v3524_v19, %v3525_v60  ;;  %v3531_v1 = vrot.slane %v3530_v28, 4  ;;  %v3445_v23 = vmax.f32 %v3421_v32, 0.0  ;;  %v4671_v20 = vpop.f32.mrb[44].mxu0 }
 0x44f   : > { %v3537_v39 = vmax.f32 %v3483_v35, %v3484_v57  ;;  %v3424_v24 = vadd.f32 %v4671_v20, %v6465_v4  ;;  %v3361_v25 = vpop.f32.mrb[45].mxu0  ;;  %v3486_v51 = vmul.f32 %v6477_v22, %v3446_v11  ;;  %v2048_v22 = vrot.slane %v2047_v34, 1 }
 0x450   : > { %v3527_v33 = vrot.slane %v3526_v55, 1  ;;  %v3532_v52 = vmax.f32 %v3530_v28, %v3531_v1  ;;  %v3485_v40 = vmul.f32 %v6487_v47, %v3445_v23  ;;  %v3423_v54 = vadd.f32 %v6465_v4, %v3361_v25 }
 0x451   : > { %v3448_v12 = vmax.f32 %v3424_v24, 0.0  ;;  %v3597_v36 = vsel %vm3596_vm14, %v3556_v49, %v3595_v7  ;;  %v2054_v53 = vmax.f32 %v2052_v30, %v2053_v13 }
 0x452   : > { %v3528_v8 = vmax.f32 %v3526_v55, %v3527_v33  ;;  %v3533_v10 = vrot.slane %v3532_v52, 2  ;;  %v3538_v5 = vmax.f32 %v3537_v39, %v3485_v40  ;;  %v3447_v21 = vmax.f32 %v3423_v54, 0.0 }
 0x453   : > { %v3488_v61 = vmul.f32 %v6487_v47, %v3448_v12  ;;  %v2049_v47 = vmax.f32 %v2047_v34, %v2048_v22  ;;  %v2055_v44 = vrot.slane %v2054_v53, 1 }
 0x454   : > { %v3557_v2 = vadd.f32 %v3528_v8, %v2035_v41  ;;  %v3534_v46 = vmax.f32 %v3532_v52, %v3533_v10  ;;  %v3539_v62 = vrot.slane %v3538_v5, 4  ;;  %v3487_v4 = vmul.f32 %v6472_v59, %v3447_v21 }
 0x455   : > { %v2056_v48 = vmax.f32 %v2054_v53, %v2055_v44 }
 0x456   : > { %v3535_v43 = vrot.slane %v3534_v46, 1  ;;  %v3540_v63 = vmax.f32 %v3538_v5, %v3539_v62  ;;  %v3545_v38 = vmax.f32 %v3486_v51, %v3487_v4  ;;  %v3599_v6 = vsel %vm3598_vm15, %v3557_v2, %v3597_v36 }
 0x458   : > { %v3536_v16 = vmax.f32 %v3534_v46, %v3535_v43  ;;  %v3541_v37 = vrot.slane %v3540_v63, 2  ;;  %v3546_v27 = vmax.f32 %v3545_v38, %v3488_v61 }
 0x45a   : > { %v3542_v9 = vmax.f32 %v3540_v63, %v3541_v37  ;;  %v3547_v31 = vrot.slane %v3546_v27, 4  ;;  %v3558_v14 = vadd.f32 %v3536_v16, %v2042_v0 }
 0x45c   : > { %v3543_v19 = vrot.slane %v3542_v9, 1  ;;  %v3548_v59 = vmax.f32 %v3546_v27, %v3547_v31  ;;  %v3601_v50 = vsel %vm3600_vm9, %v3558_v14, %v3599_v6 }
 0x45e   : > { %v3544_v15 = vmax.f32 %v3542_v9, %v3543_v19  ;;  %v3549_v7 = vrot.slane %v3548_v59, 2 }
 0x460   : > { %v3550_v57 = vmax.f32 %v3548_v59, %v3549_v7  ;;  %v3559_v29 = vadd.f32 %v3544_v15, %v2049_v47 }
 0x462   : > { %v3551_v42 = vrot.slane %v3550_v57, 1  ;;  %v3603_v45 = vsel %vm3602_vm2, %v3559_v29, %v3601_v50 }
 0x464   : > { %v3552_v60 = vmax.f32 %v3550_v57, %v3551_v42 }
 0x466   : > { %v3560_v28 = vadd.f32 %v3552_v60, %v2056_v48 }
 0x468   : > { %v3605_v32 = vsel %vm3604_vm3, %v3560_v28, %v3603_v45 }
 0x469   : > { %4705 = vmatmul.mubr.f32.vlgmr.msra.gmra.mrb[34].mxu1 %v3605_v32 }
 0x53c   : > { %v3673_v56 = vpop.f32.mrb[34].mxu1 }
 0x53d   : > { %v3674_v35 = vadd.f32 %v4032_v58, %v3673_v56  ;;  %v4706_v49 = vpop.f32.mrb[35].mxu1 }
 0x53f   : > { %3677 = vst [vmem:[%s423_s28] sm:$0xff] %v3674_v35 }
 0x540   : > { %4997 = shalt.err (!%p4994_p4)
}
 0x541   : > { %s4998_s17 = scalar_lea.hbm %s6553_s15, 128  ;;  %s5002_s16 = scalar_lea.hbm %s6607_s12, 256 }
 0x542   : > { %p4999_p7 = scmp.ne.s32.totalorder %s6553_s15, %s4998_s17  ;;  %p5003_p10 = scmp.lt.u32.totalorder %s6553_s15, %s6607_s12 }
 0x543   : > { %p5004_p11 = scmp.lt.u32.totalorder %s5002_s16, %s4998_s17  ;;  %p5006_p13 = scmp.lt.u32.totalorder %s4998_s17, %s6553_s15 }
 0x544   : > { %p5000_p8 = pnand %p4999_p7, %p5156_p5 }
 0x545   : > { %p5005_p12 = por %p5004_p11, %p5003_p10 }
 0x546   : > { %p5001_p9 = pneg %p5000_p8 }
 0x547   : > { %p5007_p0 = por %p5006_p13, %p5005_p12 }
 0x549   : > { %p5008_p1 = pnand %p5007_p0, %p5001_p9 }
 0x54b   : > { %5011 = shalt.err (!%p5008_p1)
}
 0x54c   : > { %4939 = dma.vmem_to_hbm [thread:$0]  (%p5156_p5), %s6555_s29, 128, %s6553_s15, %s3679_s30  }
 0x54d PF: > { %p4945_p2 = scmp.ge.s32.totalorder %s5046_s24, 2  ;;  %s3704_s19 = sand.u32 1, %s5034_s21  }
 0x54e   : > { %s3705_s18 = scalar_lea.sflag [#allocation3], %s3704_s19 }
 0x54f   : > { %p4942_p3 = pnand %p4945_p2, %p5160_p6 }
 0x551   : > { %5029 = dma.done.wait (!%p4942_p3), %s3705_s18, 128  }
 0x552   : > { %5031 = vsyncadd (!%p4942_p3), %s3705_s18, 4294967168  ;;  %s6702_s20 = sld [smem:[#allocation5_spill]]  ;;  %s6703_s23 = sld [smem:[#allocation6_spill]] }
 0x553   : > { %p22_p4 = scmp.ge.s32.totalorder %s5143_s27, 4   ;;  %s6704_s21 = smov %s5038_s22 }
 0x554   : > { %s6706_s24 = smov %s5143_s27 }
 0x555   :  { %24 = sbr.rel (!%p22_p4) target bundleno = 3 (0x3), region = 112 }
 0x558   : > { %s6705_s22 = smov %s6702_s20 }
 0x55c   :  { %3710 = vsyncpa [#allocation3], 1 }
 0x55d   :  { %3712 = vsyncpa [#allocation3 + $0x1], 1 }

</bundles_post_ra>
